<compile_context>
chip_gen: v7x
topology: tpu7x:2x2x1
jax: 0.10.0
libtpu: 0.0.40
codegen_flags: <defaults>
</compile_context>

<pallas_src>
import jax
import jax.numpy as jnp
from jax import lax
from jax.experimental import pallas as pl
from jax.experimental.pallas import tpu as pltpu

# ---- hyperparameters ------------------------------------------------------------------
BATCH = 2
BPAD = 8           # decoder batch padded to one sublane tile
IN_CH = 4
IMG_HW = 16
CNN_FEAT = 48      # stand-in for backbone.fc.in_features
EMBED = 24
HIDDEN = 32
VOCAB = 40
LANES = 128        # lane-dense width used for slabs / logits
SEQ = 8            # decoder sees 1 feature step + (SEQ-1) token steps
K_PAD = 40         # 9*IN_CH=36 padded to a multiple of 8

# f32 slab row layout
F_CONVW = 0          # rows 0:40   conv weights  [36 valid, 48 valid cols]
F_ENCW = 40          # rows 40:168 enc_fc_w/HW   [48 valid rows, 24 valid cols]
F_CONVB = 168        # single bias rows, each at an 8-aligned offset
F_ENCB = 176
F_GAMMA = 184
F_BETA = 192
F_GATEB = 200        # ffc_b @ w_ih + b_ih
F_BHH = 208
F_BO = 216
F_ROWS = 224

# bf16 slab row layout
B_FEATG = 0          # rows 0:128   ffc_w @ w_ih          [24 valid rows, 96 valid cols]
B_TOKG = 128         # rows 128:256 embed @ ffc_w @ w_ih  [40 valid rows, 96 valid cols]
B_WHH = 256          # rows 256:288 w_hh                  [96 valid cols]
B_WO = 288           # rows 288:320 out_w                 [40 valid cols]
B_ROWS = 320

VMEM_SPEC = pl.BlockSpec(memory_space=pltpu.MemorySpace.VMEM)


# ---- fused Pallas kernel ----------------------------------------------------------------
def captioning_kernel(patches_ref, pool_ref, cap_ref, wf_ref, wb_ref, out_ref,
                      xg_ref, hall_ref):
    """Full ImageCaptioningModel forward in one kernel.

    patches_ref : [B*HW, K_PAD]     f32 im2col conv patches (K padded with zeros)
    pool_ref    : [BPAD, B*HW]      f32 {0,1} block-sum matrix (rows >= B are zero)
    cap_ref     : [(T-1)*BPAD, 1]   int32 caption ids, time-major, batch padded
    wf_ref      : [F_ROWS, 128]     f32 parameter slab
    wb_ref      : [B_ROWS, 128]     bf16 parameter slab
    out_ref     : [T*BPAD, 128]     f32 time-major, lane-dense logits
    xg_ref      : [T*BPAD, 128]     f32 scratch: input-side GRU gates for all steps
    hall_ref    : [T*BPAD, H]       f32 scratch: hidden states for all steps
    """
    f32, bf16 = jnp.float32, jnp.bfloat16
    B, BP, T, H = BATCH, BPAD, SEQ, HIDDEN

    # ---- Encoder stand-in: conv (im2col matmul) + ReLU + global sum-pool (f32) -------
    conv_w = wf_ref[F_CONVW:F_CONVW + K_PAD, :]                       # [40, 128]
    conv_b = wf_ref[F_CONVB:F_CONVB + 1, :]
    conv = jnp.dot(patches_ref[...], conv_w, preferred_element_type=f32)
    conv = jnp.maximum(conv + conv_b, 0.0)                            # [B*HW, 128]
    # GAP as a matmul with a {0,1} block matrix (1/HW is folded into enc_fc_w).
    feat = jnp.dot(pool_ref[...], conv, preferred_element_type=f32)   # [BPAD, 128]

    # ---- Encoder head: Linear + BatchNorm1d (training-mode batch stats, f32) ---------
    encw = wf_ref[F_ENCW:F_ENCW + LANES, :]                           # [128, 128]
    encb = wf_ref[F_ENCB:F_ENCB + 1, :]
    lin_nb = jnp.dot(feat, encw, preferred_element_type=f32)          # [BPAD, 128]
    # rows >= B of lin_nb are exactly zero (pool rows are zero), so summing all BPAD
    # rows equals summing the real batch.
    mean = jnp.sum(lin_nb, axis=0, keepdims=True) * (1.0 / B) + encb
    diff = lin_nb + encb - mean
    rows = lax.broadcasted_iota(jnp.int32, (BP, 1), 0)
    var = jnp.sum(jnp.where(rows < B, diff * diff, 0.0),
                  axis=0, keepdims=True) * (1.0 / B)                  # biased, as BN fwd
    gamma = wf_ref[F_GAMMA:F_GAMMA + 1, :]
    beta = wf_ref[F_BETA:F_BETA + 1, :]
    features = diff * lax.rsqrt(var + 1e-5) * gamma + beta            # [BPAD, 128]

    # ---- Decoder input-side gates, batched over ALL timesteps (bf16 MXU, f32 acc) ----
    gate_b = wf_ref[F_GATEB:F_GATEB + 1, :]
    # feature step (t == 0): features @ (ffc_w @ w_ih)
    feat_gate_w = wb_ref[B_FEATG:B_FEATG + LANES, :]
    xg_feat = jnp.dot(features.astype(bf16), feat_gate_w, preferred_element_type=f32)
    xg_ref[0:BP, :] = xg_feat + gate_b
    # token steps (t >= 1): onehot @ (embed @ ffc_w @ w_ih)
    tok_gate_w = wb_ref[B_TOKG:B_TOKG + LANES, :]
    onehot = (cap_ref[...] ==
              lax.broadcasted_iota(jnp.int32, ((T - 1) * BP, LANES), 1)).astype(bf16)
    xg_tok = jnp.dot(onehot, tok_gate_w, preferred_element_type=f32)
    xg_ref[BP:T * BP, :] = xg_tok + gate_b

    # ---- GRU recurrence: only h @ W_hh remains on the serial dependence chain --------
    whh = wb_ref[B_WHH:B_WHH + H, :]                                  # bf16 [32, 128]
    bhh = wf_ref[F_BHH:F_BHH + 1, :]
    h = jnp.zeros((BP, H), f32)
    for t in range(T):        # static unroll; gates are scratch-backed so live ranges stay small
        xg = xg_ref[t * BP:(t + 1) * BP, :]                           # aligned [8, 128]
        hg = jnp.dot(h.astype(bf16), whh, preferred_element_type=f32) + bhh
        r = jax.nn.sigmoid(xg[:, 0:H] + hg[:, 0:H])
        z = jax.nn.sigmoid(xg[:, H:2 * H] + hg[:, H:2 * H])
        n = jnp.tanh(xg[:, 2 * H:3 * H] + r * hg[:, 2 * H:3 * H])
        h = (1.0 - z) * n + z * h
        hall_ref[t * BP:(t + 1) * BP, :] = h                          # aligned [8, 32]

    # ---- Deferred, lane-dense output projection: one matmul, one unmasked store -------
    wo = wb_ref[B_WO:B_WO + H, :]                                     # bf16 [32, 128]
    bo = wf_ref[F_BO:F_BO + 1, :]
    out_ref[...] = jnp.dot(hall_ref[...].astype(bf16), wo,
                           preferred_element_type=f32) + bo


# ---- parameter prep (runs once, outside the per-call graph) ----------------------------
def prepare_params(params):
    HW = IMG_HW * IMG_HW

    # f32 slab
    wf = jnp.zeros((F_ROWS, LANES), jnp.float32)
    conv_w2d = params["conv_w"].reshape(9 * IN_CH, CNN_FEAT)
    wf = wf.at[F_CONVW:F_CONVW + 9 * IN_CH, 0:CNN_FEAT].set(conv_w2d)
    wf = wf.at[F_ENCW:F_ENCW + CNN_FEAT, 0:EMBED].set(params["enc_fc_w"] / HW)
    wf = wf.at[F_CONVB, 0:CNN_FEAT].set(params["conv_b"][0])
    wf = wf.at[F_ENCB, 0:EMBED].set(params["enc_fc_b"][0])
    wf = wf.at[F_GAMMA, 0:EMBED].set(params["bn_gamma"][0])
    wf = wf.at[F_BETA, 0:EMBED].set(params["bn_beta"][0])
    gate_bias = params["ffc_b"] @ params["w_ih"] + params["b_ih"]      # [1, 3H]
    wf = wf.at[F_GATEB, 0:3 * HIDDEN].set(gate_bias[0])
    wf = wf.at[F_BHH, 0:3 * HIDDEN].set(params["b_hh"][0])
    wf = wf.at[F_BO, 0:VOCAB].set(params["out_b"][0])

    # bf16 slab (parameter-only products folded in f32, rounded once)
    feat_gate = params["ffc_w"] @ params["w_ih"]                       # [E, 3H]
    tok_gate = params["embed"] @ feat_gate                             # [V, 3H]
    wb = jnp.zeros((B_ROWS, LANES), jnp.float32)
    wb = wb.at[B_FEATG:B_FEATG + EMBED, 0:3 * HIDDEN].set(feat_gate)
    wb = wb.at[B_TOKG:B_TOKG + VOCAB, 0:3 * HIDDEN].set(tok_gate)
    wb = wb.at[B_WHH:B_WHH + HIDDEN, 0:3 * HIDDEN].set(params["w_hh"])
    wb = wb.at[B_WO:B_WO + HIDDEN, 0:VOCAB].set(params["out_w"])
    wb = wb.astype(jnp.bfloat16)

    # exact {0,1} block-sum pool matrix (rows >= BATCH are zero)
    col = jnp.arange(BATCH * HW, dtype=jnp.int32) // HW
    row = jnp.arange(BPAD, dtype=jnp.int32)
    pool = (row[:, None] == col[None, :]).astype(jnp.float32)          # [BPAD, B*HW]

    return {"wf": wf, "wb": wb, "pool": pool}


# ---- jitted wrapper ---------------------------------------------------------------------
@jax.jit
def image_captioning_forward(prep, images, captions):
    B = images.shape[0]
    H = W = IMG_HW

    # NCHW -> NHWC, zero-pad, im2col (layout plumbing stays in XLA; matmuls in-kernel).
    x = jnp.transpose(images, (0, 2, 3, 1)).astype(jnp.float32)
    xp = jnp.pad(x, ((0, 0), (1, 1), (1, 1), (0, 0)))
    pats = [xp[:, kh:kh + H, kw:kw + W, :] for kh in range(3) for kw in range(3)]
    patches = jnp.stack(pats, axis=3).reshape(B * H * W, 9 * IN_CH)
    patches = jnp.pad(patches, ((0, 0), (0, K_PAD - 9 * IN_CH)))       # [512, 40]

    # time-major, batch-padded caption ids for the decoder
    cap_in = captions[:, :-1].astype(jnp.int32)                        # [B, T-1]
    cap_pad = jnp.zeros((SEQ - 1, BPAD), jnp.int32).at[:, :B].set(cap_in.T)
    cap_flat = cap_pad.reshape((SEQ - 1) * BPAD, 1)

    logits_flat = pl.pallas_call(
        captioning_kernel,
        out_shape=jax.ShapeDtypeStruct((SEQ * BPAD, LANES), jnp.float32),
        in_specs=[VMEM_SPEC] * 5,
        out_specs=VMEM_SPEC,
        scratch_shapes=[pltpu.VMEM((SEQ * BPAD, LANES), jnp.float32),   # gate buffer
                        pltpu.VMEM((SEQ * BPAD, HIDDEN), jnp.float32)], # hidden states
    )(patches, prep["pool"], cap_flat, prep["wf"], prep["wb"])

    # time-major [T*BPAD, 128] -> [B, T, V]
    return logits_flat.reshape(SEQ, BPAD, LANES).transpose(1, 0, 2)[:B, :, :VOCAB]


# ---- deterministic parameter init (synthetic, PyTorch-default-like scales) ---------------
def init_params(key):
    ks = jax.random.split(key, 12)

    def u(k, shape, fan_in):
        bound = 1.0 / jnp.sqrt(jnp.float32(fan_in))
        return jax.random.uniform(k, shape, jnp.float32, -bound, bound)

    p = {}
    p["conv_w"] = u(ks[0], (3, 3, IN_CH, CNN_FEAT), 3 * 3 * IN_CH)
    p["conv_b"] = u(ks[1], (1, CNN_FEAT), 3 * 3 * IN_CH)
    p["enc_fc_w"] = u(ks[2], (CNN_FEAT, EMBED), CNN_FEAT)
    p["enc_fc_b"] = u(ks[3], (1, EMBED), CNN_FEAT)
    p["bn_gamma"] = jnp.ones((1, EMBED), jnp.float32)
    p["bn_beta"] = jnp.zeros((1, EMBED), jnp.float32)
    p["embed"] = jax.random.normal(ks[4], (VOCAB, EMBED), jnp.float32)
    p["ffc_w"] = u(ks[5], (EMBED, HIDDEN), EMBED)
    p["ffc_b"] = u(ks[6], (1, HIDDEN), EMBED)
    # fused GRU gate weights, (r|z|n) stacked along the output dim (PyTorch layout)
    p["w_ih"] = u(ks[7], (HIDDEN, 3 * HIDDEN), HIDDEN)
    p["b_ih"] = u(ks[8], (1, 3 * HIDDEN), HIDDEN)
    p["w_hh"] = u(ks[9], (HIDDEN, 3 * HIDDEN), HIDDEN)
    p["b_hh"] = u(ks[10], (1, 3 * HIDDEN), HIDDEN)
    p["out_w"] = u(ks[11], (HIDDEN, VOCAB), HIDDEN)
    p["out_b"] = jnp.zeros((1, VOCAB), jnp.float32)
    return p


# ---- pure-JAX reference (faithful f32, unfused params) ------------------------------------
def reference_forward(params, images, captions):
    x = jnp.transpose(images, (0, 2, 3, 1)).astype(jnp.float32)
    y = lax.conv_general_dilated(x, params["conv_w"], (1, 1), "SAME",
                                 dimension_numbers=("NHWC", "HWIO", "NHWC"))
    y = jnp.maximum(y + params["conv_b"].reshape(1, 1, 1, -1), 0.0)
    feat = jnp.mean(y, axis=(1, 2))

    lin = feat @ params["enc_fc_w"] + params["enc_fc_b"]
    mean = jnp.mean(lin, axis=0, keepdims=True)
    var = jnp.mean((lin - mean) ** 2, axis=0, keepdims=True)
    features = (lin - mean) * lax.rsqrt(var + 1e-5) * params["bn_gamma"] + params["bn_beta"]

    cap = captions[:, :-1]
    emb = params["embed"][cap]
    inputs = jnp.concatenate([features[:, None, :], emb], axis=1)
    xh = inputs @ params["ffc_w"] + params["ffc_b"]

    B, T, _ = xh.shape
    H = HIDDEN
    h = jnp.zeros((B, H), jnp.float32)
    outs = []
    for t in range(T):
        xg = xh[:, t, :] @ params["w_ih"] + params["b_ih"]
        hg = h @ params["w_hh"] + params["b_hh"]
        r = jax.nn.sigmoid(xg[:, 0:H] + hg[:, 0:H])
        z = jax.nn.sigmoid(xg[:, H:2 * H] + hg[:, H:2 * H])
        n = jnp.tanh(xg[:, 2 * H:3 * H] + r * hg[:, 2 * H:3 * H])
        h = (1.0 - z) * n + z * h
        outs.append(h @ params["out_w"] + params["out_b"])
    return jnp.stack(outs, axis=1)


if __name__ == "__main__":
    key = jax.random.PRNGKey(0)
    pkey, ikey, ckey = jax.random.split(key, 3)
    params = init_params(pkey)
    prep = prepare_params(params)

    images = jax.random.normal(ikey, (BATCH, IN_CH, IMG_HW, IMG_HW), jnp.float32)
    captions = jax.random.randint(ckey, (BATCH, SEQ), 0, VOCAB, dtype=jnp.int32)

    out = image_captioning_forward(prep, images, captions)
    out = jax.block_until_ready(out)

    ref = reference_forward(params, images, captions)
    assert out.shape == (BATCH, SEQ, VOCAB), out.shape
    # decoder matmuls use bf16 operands (f32 accumulation) -> slightly looser tolerance
    if not jnp.allclose(out, ref, atol=2e-2, rtol=2e-2):
        raise AssertionError("Pallas output does not match pure-JAX reference")
    print("KERNEL_OK")
</pallas_src>

<mosaic_0001>
module attributes {stable_mosaic.version = 11 : i64} {
  func.func @captioning_kernel(%arg0: memref<512x40xf32, #tpu.memory_space<vmem>>, %arg1: memref<8x512xf32, #tpu.memory_space<vmem>>, %arg2: memref<56x1xi32, #tpu.memory_space<vmem>>, %arg3: memref<224x128xf32, #tpu.memory_space<vmem>>, %arg4: memref<320x128xbf16, #tpu.memory_space<vmem>>, %arg5: memref<64x128xf32, #tpu.memory_space<vmem>>, %arg6: memref<64x128xf32, #tpu.memory_space<vmem>>, %arg7: memref<64x32xf32, #tpu.memory_space<vmem>>) attributes {dimension_semantics = [], scalar_prefetch = 0 : i64, scratch_operands = 2 : i64, tpu.core_type = #tpu.core_type<tc>} {
    %c0 = arith.constant 0 : index
    %c0_0 = arith.constant 0 : index
    %0 = vector.load %arg3[%c0, %c0_0] : memref<224x128xf32, #tpu.memory_space<vmem>>, vector<40x128xf32>
    %c168 = arith.constant 168 : index
    %c0_1 = arith.constant 0 : index
    %1 = vector.load %arg3[%c168, %c0_1] : memref<224x128xf32, #tpu.memory_space<vmem>>, vector<1x128xf32>
    %c0_2 = arith.constant 0 : index
    %c0_3 = arith.constant 0 : index
    %2 = vector.load %arg0[%c0_2, %c0_3] : memref<512x40xf32, #tpu.memory_space<vmem>>, vector<512x40xf32>
    %cst = arith.constant dense<0.000000e+00> : vector<512x128xf32>
    %3 = tpu.matmul %2, %0, %cst {dimension_numbers = #tpu.dot_dimension_numbers<[1], [0], [0], [1], [0, 0, 1, 1], [], []>} : vector<512x40xf32>, vector<40x128xf32>, vector<512x128xf32> -> vector<512x128xf32>
    %4 = vector.broadcast %1 : vector<1x128xf32> to vector<512x128xf32>
    %5 = arith.addf %3, %4 : vector<512x128xf32>
    %cst_4 = arith.constant 0.000000e+00 : f32
    %6 = vector.broadcast %cst_4 : f32 to vector<512x128xf32>
    %7 = arith.maximumf %5, %6 : vector<512x128xf32>
    %c0_5 = arith.constant 0 : index
    %c0_6 = arith.constant 0 : index
    %8 = vector.load %arg1[%c0_5, %c0_6] : memref<8x512xf32, #tpu.memory_space<vmem>>, vector<8x512xf32>
    %cst_7 = arith.constant dense<0.000000e+00> : vector<8x128xf32>
    %9 = tpu.matmul %8, %7, %cst_7 {dimension_numbers = #tpu.dot_dimension_numbers<[1], [0], [0], [1], [0, 0, 1, 1], [], []>} : vector<8x512xf32>, vector<512x128xf32>, vector<8x128xf32> -> vector<8x128xf32>
    %c40 = arith.constant 40 : index
    %c0_8 = arith.constant 0 : index
    %10 = vector.load %arg3[%c40, %c0_8] : memref<224x128xf32, #tpu.memory_space<vmem>>, vector<128x128xf32>
    %c176 = arith.constant 176 : index
    %c0_9 = arith.constant 0 : index
    %11 = vector.load %arg3[%c176, %c0_9] : memref<224x128xf32, #tpu.memory_space<vmem>>, vector<1x128xf32>
    %cst_10 = arith.constant dense<0.000000e+00> : vector<8x128xf32>
    %12 = tpu.matmul %9, %10, %cst_10 {dimension_numbers = #tpu.dot_dimension_numbers<[1], [0], [0], [1], [0, 0, 1, 1], [], []>} : vector<8x128xf32>, vector<128x128xf32>, vector<8x128xf32> -> vector<8x128xf32>
    %cst_11 = arith.constant dense<0.000000e+00> : vector<128xf32>
    %13 = vector.multi_reduction <add>, %12, %cst_11 [0] : vector<8x128xf32> to vector<128xf32>
    %14 = vector.shape_cast %13 : vector<128xf32> to vector<1x128xf32>
    %cst_12 = arith.constant 5.000000e-01 : f32
    %15 = vector.broadcast %cst_12 : f32 to vector<1x128xf32>
    %16 = arith.mulf %14, %15 : vector<1x128xf32>
    %17 = arith.addf %16, %11 : vector<1x128xf32>
    %18 = vector.broadcast %11 : vector<1x128xf32> to vector<8x128xf32>
    %19 = arith.addf %12, %18 : vector<8x128xf32>
    %20 = vector.broadcast %17 : vector<1x128xf32> to vector<8x128xf32>
    %21 = arith.subf %19, %20 : vector<8x128xf32>
    %22 = tpu.iota {dimensions = array<i32: 0>} : vector<8x1xi32>
    %c2_i32 = arith.constant 2 : i32
    %23 = vector.broadcast %c2_i32 : i32 to vector<8x1xi32>
    %24 = arith.cmpi slt, %22, %23 : vector<8x1xi32>
    %25 = arith.mulf %21, %21 : vector<8x128xf32>
    %cst_13 = arith.constant 0.000000e+00 : f32
    %26 = vector.shape_cast %24 : vector<8x1xi1> to vector<8x1xi1>
    %27 = vector.broadcast %26 : vector<8x1xi1> to vector<8x128xi1>
    %28 = vector.broadcast %cst_13 : f32 to vector<8x128xf32>
    %29 = arith.select %27, %25, %28 : vector<8x128xi1>, vector<8x128xf32>
    %cst_14 = arith.constant dense<0.000000e+00> : vector<128xf32>
    %30 = vector.multi_reduction <add>, %29, %cst_14 [0] : vector<8x128xf32> to vector<128xf32>
    %31 = vector.shape_cast %30 : vector<128xf32> to vector<1x128xf32>
    %cst_15 = arith.constant 5.000000e-01 : f32
    %32 = vector.broadcast %cst_15 : f32 to vector<1x128xf32>
    %33 = arith.mulf %31, %32 : vector<1x128xf32>
    %c184 = arith.constant 184 : index
    %c0_16 = arith.constant 0 : index
    %34 = vector.load %arg3[%c184, %c0_16] : memref<224x128xf32, #tpu.memory_space<vmem>>, vector<1x128xf32>
    %c192 = arith.constant 192 : index
    %c0_17 = arith.constant 0 : index
    %35 = vector.load %arg3[%c192, %c0_17] : memref<224x128xf32, #tpu.memory_space<vmem>>, vector<1x128xf32>
    %cst_18 = arith.constant 9.99999974E-6 : f32
    %36 = vector.broadcast %cst_18 : f32 to vector<1x128xf32>
    %37 = arith.addf %33, %36 : vector<1x128xf32>
    %38 = math.rsqrt %37 : vector<1x128xf32>
    %39 = vector.broadcast %38 : vector<1x128xf32> to vector<8x128xf32>
    %40 = arith.mulf %21, %39 : vector<8x128xf32>
    %41 = vector.broadcast %34 : vector<1x128xf32> to vector<8x128xf32>
    %42 = arith.mulf %40, %41 : vector<8x128xf32>
    %43 = vector.broadcast %35 : vector<1x128xf32> to vector<8x128xf32>
    %44 = arith.addf %42, %43 : vector<8x128xf32>
    %c200 = arith.constant 200 : index
    %c0_19 = arith.constant 0 : index
    %45 = vector.load %arg3[%c200, %c0_19] : memref<224x128xf32, #tpu.memory_space<vmem>>, vector<1x128xf32>
    %c0_20 = arith.constant 0 : index
    %c0_21 = arith.constant 0 : index
    %46 = vector.load %arg4[%c0_20, %c0_21] : memref<320x128xbf16, #tpu.memory_space<vmem>>, vector<128x128xbf16>
    %47 = arith.truncf %44 : vector<8x128xf32> to vector<8x128xbf16>
    %cst_22 = arith.constant dense<0.000000e+00> : vector<8x128xf32>
    %48 = tpu.matmul %47, %46, %cst_22 {dimension_numbers = #tpu.dot_dimension_numbers<[1], [0], [0], [1], [0, 0, 1, 1], [], []>} : vector<8x128xbf16>, vector<128x128xbf16>, vector<8x128xf32> -> vector<8x128xf32>
    %49 = vector.broadcast %45 : vector<1x128xf32> to vector<8x128xf32>
    %50 = arith.addf %48, %49 : vector<8x128xf32>
    %c0_23 = arith.constant 0 : index
    %c0_24 = arith.constant 0 : index
    %51 = vector.load %arg6[%c0_23, %c0_24] : memref<64x128xf32, #tpu.memory_space<vmem>>, vector<8x128xf32>
    tpu.vector_store %arg6[%c0_23, %c0_24], %50 {strides = array<i32>} : memref<64x128xf32, #tpu.memory_space<vmem>>, vector<8x128xf32>,
    %c128 = arith.constant 128 : index
    %c0_25 = arith.constant 0 : index
    %52 = vector.load %arg4[%c128, %c0_25] : memref<320x128xbf16, #tpu.memory_space<vmem>>, vector<128x128xbf16>
    %c0_26 = arith.constant 0 : index
    %c0_27 = arith.constant 0 : index
    %53 = vector.load %arg2[%c0_26, %c0_27] : memref<56x1xi32, #tpu.memory_space<vmem>>, vector<56x1xi32>
    %54 = tpu.iota {dimensions = array<i32: 1>} : vector<56x128xi32>
    %55 = vector.broadcast %53 : vector<56x1xi32> to vector<56x128xi32>
    %56 = arith.cmpi eq, %55, %54 : vector<56x128xi32>
    %57 = arith.extui %56 : vector<56x128xi1> to vector<56x128xi32>
    %58 = arith.sitofp %57 : vector<56x128xi32> to vector<56x128xf32>
    %59 = arith.truncf %58 : vector<56x128xf32> to vector<56x128xbf16>
    %cst_28 = arith.constant dense<0.000000e+00> : vector<56x128xf32>
    %60 = tpu.matmul %59, %52, %cst_28 {dimension_numbers = #tpu.dot_dimension_numbers<[1], [0], [0], [1], [0, 0, 1, 1], [], []>} : vector<56x128xbf16>, vector<128x128xbf16>, vector<56x128xf32> -> vector<56x128xf32>
    %61 = vector.broadcast %45 : vector<1x128xf32> to vector<56x128xf32>
    %62 = arith.addf %60, %61 : vector<56x128xf32>
    %c8 = arith.constant 8 : index
    %c0_29 = arith.constant 0 : index
    %63 = vector.load %arg6[%c8, %c0_29] : memref<64x128xf32, #tpu.memory_space<vmem>>, vector<56x128xf32>
    tpu.vector_store %arg6[%c8, %c0_29], %62 {strides = array<i32>} : memref<64x128xf32, #tpu.memory_space<vmem>>, vector<56x128xf32>,
    %c256 = arith.constant 256 : index
    %c0_30 = arith.constant 0 : index
    %64 = vector.load %arg4[%c256, %c0_30] : memref<320x128xbf16, #tpu.memory_space<vmem>>, vector<32x128xbf16>
    %c208 = arith.constant 208 : index
    %c0_31 = arith.constant 0 : index
    %65 = vector.load %arg3[%c208, %c0_31] : memref<224x128xf32, #tpu.memory_space<vmem>>, vector<1x128xf32>
    %cst_32 = arith.constant 0.000000e+00 : f32
    %66 = vector.broadcast %cst_32 : f32 to vector<8x32xf32>
    %c0_33 = arith.constant 0 : index
    %c0_34 = arith.constant 0 : index
    %67 = vector.load %arg6[%c0_33, %c0_34] : memref<64x128xf32, #tpu.memory_space<vmem>>, vector<8x128xf32>
    %68 = arith.truncf %66 : vector<8x32xf32> to vector<8x32xbf16>
    %cst_35 = arith.constant dense<0.000000e+00> : vector<8x128xf32>
    %69 = tpu.matmul %68, %64, %cst_35 {dimension_numbers = #tpu.dot_dimension_numbers<[1], [0], [0], [1], [0, 0, 1, 1], [], []>} : vector<8x32xbf16>, vector<32x128xbf16>, vector<8x128xf32> -> vector<8x128xf32>
    %70 = vector.broadcast %65 : vector<1x128xf32> to vector<8x128xf32>
    %71 = arith.addf %69, %70 : vector<8x128xf32>
    %72 = vector.extract_strided_slice %67 {offsets = [0, 0], sizes = [8, 32], strides = [1, 1]} : vector<8x128xf32> to vector<8x32xf32>
    %73 = vector.extract_strided_slice %71 {offsets = [0, 0], sizes = [8, 32], strides = [1, 1]} : vector<8x128xf32> to vector<8x32xf32>
    %74 = arith.addf %72, %73 : vector<8x32xf32>
    %75 = arith.negf %74 : vector<8x32xf32>
    %76 = math.exp %75 : vector<8x32xf32>
    %cst_36 = arith.constant 1.000000e+00 : f32
    %77 = vector.broadcast %cst_36 : f32 to vector<8x32xf32>
    %78 = arith.addf %77, %76 : vector<8x32xf32>
    %79 = arith.divf %77, %78 : vector<8x32xf32>
    %80 = vector.extract_strided_slice %67 {offsets = [0, 32], sizes = [8, 32], strides = [1, 1]} : vector<8x128xf32> to vector<8x32xf32>
    %81 = vector.extract_strided_slice %71 {offsets = [0, 32], sizes = [8, 32], strides = [1, 1]} : vector<8x128xf32> to vector<8x32xf32>
    %82 = arith.addf %80, %81 : vector<8x32xf32>
    %83 = arith.negf %82 : vector<8x32xf32>
    %84 = math.exp %83 : vector<8x32xf32>
    %cst_37 = arith.constant 1.000000e+00 : f32
    %85 = vector.broadcast %cst_37 : f32 to vector<8x32xf32>
    %86 = arith.addf %85, %84 : vector<8x32xf32>
    %87 = arith.divf %85, %86 : vector<8x32xf32>
    %88 = vector.extract_strided_slice %67 {offsets = [0, 64], sizes = [8, 32], strides = [1, 1]} : vector<8x128xf32> to vector<8x32xf32>
    %89 = vector.extract_strided_slice %71 {offsets = [0, 64], sizes = [8, 32], strides = [1, 1]} : vector<8x128xf32> to vector<8x32xf32>
    %90 = arith.mulf %79, %89 : vector<8x32xf32>
    %91 = arith.addf %88, %90 : vector<8x32xf32>
    %92 = math.tanh %91 : vector<8x32xf32>
    %cst_38 = arith.constant 1.000000e+00 : f32
    %93 = vector.broadcast %cst_38 : f32 to vector<8x32xf32>
    %94 = arith.subf %93, %87 : vector<8x32xf32>
    %95 = arith.mulf %94, %92 : vector<8x32xf32>
    %96 = arith.mulf %87, %66 : vector<8x32xf32>
    %97 = arith.addf %95, %96 : vector<8x32xf32>
    %c0_39 = arith.constant 0 : index
    %c0_40 = arith.constant 0 : index
    %98 = vector.load %arg7[%c0_39, %c0_40] : memref<64x32xf32, #tpu.memory_space<vmem>>, vector<8x32xf32>
    tpu.vector_store %arg7[%c0_39, %c0_40], %97 {strides = array<i32>} : memref<64x32xf32, #tpu.memory_space<vmem>>, vector<8x32xf32>,
    %c8_41 = arith.constant 8 : index
    %c0_42 = arith.constant 0 : index
    %99 = vector.load %arg6[%c8_41, %c0_42] : memref<64x128xf32, #tpu.memory_space<vmem>>, vector<8x128xf32>
    %100 = arith.truncf %97 : vector<8x32xf32> to vector<8x32xbf16>
    %cst_43 = arith.constant dense<0.000000e+00> : vector<8x128xf32>
    %101 = tpu.matmul %100, %64, %cst_43 {dimension_numbers = #tpu.dot_dimension_numbers<[1], [0], [0], [1], [0, 0, 1, 1], [], []>} : vector<8x32xbf16>, vector<32x128xbf16>, vector<8x128xf32> -> vector<8x128xf32>
    %102 = vector.broadcast %65 : vector<1x128xf32> to vector<8x128xf32>
    %103 = arith.addf %101, %102 : vector<8x128xf32>
    %104 = vector.extract_strided_slice %99 {offsets = [0, 0], sizes = [8, 32], strides = [1, 1]} : vector<8x128xf32> to vector<8x32xf32>
    %105 = vector.extract_strided_slice %103 {offsets = [0, 0], sizes = [8, 32], strides = [1, 1]} : vector<8x128xf32> to vector<8x32xf32>
    %106 = arith.addf %104, %105 : vector<8x32xf32>
    %107 = arith.negf %106 : vector<8x32xf32>
    %108 = math.exp %107 : vector<8x32xf32>
    %cst_44 = arith.constant 1.000000e+00 : f32
    %109 = vector.broadcast %cst_44 : f32 to vector<8x32xf32>
    %110 = arith.addf %109, %108 : vector<8x32xf32>
    %111 = arith.divf %109, %110 : vector<8x32xf32>
    %112 = vector.extract_strided_slice %99 {offsets = [0, 32], sizes = [8, 32], strides = [1, 1]} : vector<8x128xf32> to vector<8x32xf32>
    %113 = vector.extract_strided_slice %103 {offsets = [0, 32], sizes = [8, 32], strides = [1, 1]} : vector<8x128xf32> to vector<8x32xf32>
    %114 = arith.addf %112, %113 : vector<8x32xf32>
    %115 = arith.negf %114 : vector<8x32xf32>
    %116 = math.exp %115 : vector<8x32xf32>
    %cst_45 = arith.constant 1.000000e+00 : f32
    %117 = vector.broadcast %cst_45 : f32 to vector<8x32xf32>
    %118 = arith.addf %117, %116 : vector<8x32xf32>
    %119 = arith.divf %117, %118 : vector<8x32xf32>
    %120 = vector.extract_strided_slice %99 {offsets = [0, 64], sizes = [8, 32], strides = [1, 1]} : vector<8x128xf32> to vector<8x32xf32>
    %121 = vector.extract_strided_slice %103 {offsets = [0, 64], sizes = [8, 32], strides = [1, 1]} : vector<8x128xf32> to vector<8x32xf32>
    %122 = arith.mulf %111, %121 : vector<8x32xf32>
    %123 = arith.addf %120, %122 : vector<8x32xf32>
    %124 = math.tanh %123 : vector<8x32xf32>
    %cst_46 = arith.constant 1.000000e+00 : f32
    %125 = vector.broadcast %cst_46 : f32 to vector<8x32xf32>
    %126 = arith.subf %125, %119 : vector<8x32xf32>
    %127 = arith.mulf %126, %124 : vector<8x32xf32>
    %128 = arith.mulf %119, %97 : vector<8x32xf32>
    %129 = arith.addf %127, %128 : vector<8x32xf32>
    %c8_47 = arith.constant 8 : index
    %c0_48 = arith.constant 0 : index
    %130 = vector.load %arg7[%c8_47, %c0_48] : memref<64x32xf32, #tpu.memory_space<vmem>>, vector<8x32xf32>
    tpu.vector_store %arg7[%c8_47, %c0_48], %129 {strides = array<i32>} : memref<64x32xf32, #tpu.memory_space<vmem>>, vector<8x32xf32>,
    %c16 = arith.constant 16 : index
    %c0_49 = arith.constant 0 : index
    %131 = vector.load %arg6[%c16, %c0_49] : memref<64x128xf32, #tpu.memory_space<vmem>>, vector<8x128xf32>
    %132 = arith.truncf %129 : vector<8x32xf32> to vector<8x32xbf16>
    %cst_50 = arith.constant dense<0.000000e+00> : vector<8x128xf32>
    %133 = tpu.matmul %132, %64, %cst_50 {dimension_numbers = #tpu.dot_dimension_numbers<[1], [0], [0], [1], [0, 0, 1, 1], [], []>} : vector<8x32xbf16>, vector<32x128xbf16>, vector<8x128xf32> -> vector<8x128xf32>
    %134 = vector.broadcast %65 : vector<1x128xf32> to vector<8x128xf32>
    %135 = arith.addf %133, %134 : vector<8x128xf32>
    %136 = vector.extract_strided_slice %131 {offsets = [0, 0], sizes = [8, 32], strides = [1, 1]} : vector<8x128xf32> to vector<8x32xf32>
    %137 = vector.extract_strided_slice %135 {offsets = [0, 0], sizes = [8, 32], strides = [1, 1]} : vector<8x128xf32> to vector<8x32xf32>
    %138 = arith.addf %136, %137 : vector<8x32xf32>
    %139 = arith.negf %138 : vector<8x32xf32>
    %140 = math.exp %139 : vector<8x32xf32>
    %cst_51 = arith.constant 1.000000e+00 : f32
    %141 = vector.broadcast %cst_51 : f32 to vector<8x32xf32>
    %142 = arith.addf %141, %140 : vector<8x32xf32>
    %143 = arith.divf %141, %142 : vector<8x32xf32>
    %144 = vector.extract_strided_slice %131 {offsets = [0, 32], sizes = [8, 32], strides = [1, 1]} : vector<8x128xf32> to vector<8x32xf32>
    %145 = vector.extract_strided_slice %135 {offsets = [0, 32], sizes = [8, 32], strides = [1, 1]} : vector<8x128xf32> to vector<8x32xf32>
    %146 = arith.addf %144, %145 : vector<8x32xf32>
    %147 = arith.negf %146 : vector<8x32xf32>
    %148 = math.exp %147 : vector<8x32xf32>
    %cst_52 = arith.constant 1.000000e+00 : f32
    %149 = vector.broadcast %cst_52 : f32 to vector<8x32xf32>
    %150 = arith.addf %149, %148 : vector<8x32xf32>
    %151 = arith.divf %149, %150 : vector<8x32xf32>
    %152 = vector.extract_strided_slice %131 {offsets = [0, 64], sizes = [8, 32], strides = [1, 1]} : vector<8x128xf32> to vector<8x32xf32>
    %153 = vector.extract_strided_slice %135 {offsets = [0, 64], sizes = [8, 32], strides = [1, 1]} : vector<8x128xf32> to vector<8x32xf32>
    %154 = arith.mulf %143, %153 : vector<8x32xf32>
    %155 = arith.addf %152, %154 : vector<8x32xf32>
    %156 = math.tanh %155 : vector<8x32xf32>
    %cst_53 = arith.constant 1.000000e+00 : f32
    %157 = vector.broadcast %cst_53 : f32 to vector<8x32xf32>
    %158 = arith.subf %157, %151 : vector<8x32xf32>
    %159 = arith.mulf %158, %156 : vector<8x32xf32>
    %160 = arith.mulf %151, %129 : vector<8x32xf32>
    %161 = arith.addf %159, %160 : vector<8x32xf32>
    %c16_54 = arith.constant 16 : index
    %c0_55 = arith.constant 0 : index
    %162 = vector.load %arg7[%c16_54, %c0_55] : memref<64x32xf32, #tpu.memory_space<vmem>>, vector<8x32xf32>
    tpu.vector_store %arg7[%c16_54, %c0_55], %161 {strides = array<i32>} : memref<64x32xf32, #tpu.memory_space<vmem>>, vector<8x32xf32>,
    %c24 = arith.constant 24 : index
    %c0_56 = arith.constant 0 : index
    %163 = vector.load %arg6[%c24, %c0_56] : memref<64x128xf32, #tpu.memory_space<vmem>>, vector<8x128xf32>
    %164 = arith.truncf %161 : vector<8x32xf32> to vector<8x32xbf16>
    %cst_57 = arith.constant dense<0.000000e+00> : vector<8x128xf32>
    %165 = tpu.matmul %164, %64, %cst_57 {dimension_numbers = #tpu.dot_dimension_numbers<[1], [0], [0], [1], [0, 0, 1, 1], [], []>} : vector<8x32xbf16>, vector<32x128xbf16>, vector<8x128xf32> -> vector<8x128xf32>
    %166 = vector.broadcast %65 : vector<1x128xf32> to vector<8x128xf32>
    %167 = arith.addf %165, %166 : vector<8x128xf32>
    %168 = vector.extract_strided_slice %163 {offsets = [0, 0], sizes = [8, 32], strides = [1, 1]} : vector<8x128xf32> to vector<8x32xf32>
    %169 = vector.extract_strided_slice %167 {offsets = [0, 0], sizes = [8, 32], strides = [1, 1]} : vector<8x128xf32> to vector<8x32xf32>
    %170 = arith.addf %168, %169 : vector<8x32xf32>
    %171 = arith.negf %170 : vector<8x32xf32>
    %172 = math.exp %171 : vector<8x32xf32>
    %cst_58 = arith.constant 1.000000e+00 : f32
    %173 = vector.broadcast %cst_58 : f32 to vector<8x32xf32>
    %174 = arith.addf %173, %172 : vector<8x32xf32>
    %175 = arith.divf %173, %174 : vector<8x32xf32>
    %176 = vector.extract_strided_slice %163 {offsets = [0, 32], sizes = [8, 32], strides = [1, 1]} : vector<8x128xf32> to vector<8x32xf32>
    %177 = vector.extract_strided_slice %167 {offsets = [0, 32], sizes = [8, 32], strides = [1, 1]} : vector<8x128xf32> to vector<8x32xf32>
    %178 = arith.addf %176, %177 : vector<8x32xf32>
    %179 = arith.negf %178 : vector<8x32xf32>
    %180 = math.exp %179 : vector<8x32xf32>
    %cst_59 = arith.constant 1.000000e+00 : f32
    %181 = vector.broadcast %cst_59 : f32 to vector<8x32xf32>
    %182 = arith.addf %181, %180 : vector<8x32xf32>
    %183 = arith.divf %181, %182 : vector<8x32xf32>
    %184 = vector.extract_strided_slice %163 {offsets = [0, 64], sizes = [8, 32], strides = [1, 1]} : vector<8x128xf32> to vector<8x32xf32>
    %185 = vector.extract_strided_slice %167 {offsets = [0, 64], sizes = [8, 32], strides = [1, 1]} : vector<8x128xf32> to vector<8x32xf32>
    %186 = arith.mulf %175, %185 : vector<8x32xf32>
    %187 = arith.addf %184, %186 : vector<8x32xf32>
    %188 = math.tanh %187 : vector<8x32xf32>
    %cst_60 = arith.constant 1.000000e+00 : f32
    %189 = vector.broadcast %cst_60 : f32 to vector<8x32xf32>
    %190 = arith.subf %189, %183 : vector<8x32xf32>
    %191 = arith.mulf %190, %188 : vector<8x32xf32>
    %192 = arith.mulf %183, %161 : vector<8x32xf32>
    %193 = arith.addf %191, %192 : vector<8x32xf32>
    %c24_61 = arith.constant 24 : index
    %c0_62 = arith.constant 0 : index
    %194 = vector.load %arg7[%c24_61, %c0_62] : memref<64x32xf32, #tpu.memory_space<vmem>>, vector<8x32xf32>
    tpu.vector_store %arg7[%c24_61, %c0_62], %193 {strides = array<i32>} : memref<64x32xf32, #tpu.memory_space<vmem>>, vector<8x32xf32>,
    %c32 = arith.constant 32 : index
    %c0_63 = arith.constant 0 : index
    %195 = vector.load %arg6[%c32, %c0_63] : memref<64x128xf32, #tpu.memory_space<vmem>>, vector<8x128xf32>
    %196 = arith.truncf %193 : vector<8x32xf32> to vector<8x32xbf16>
    %cst_64 = arith.constant dense<0.000000e+00> : vector<8x128xf32>
    %197 = tpu.matmul %196, %64, %cst_64 {dimension_numbers = #tpu.dot_dimension_numbers<[1], [0], [0], [1], [0, 0, 1, 1], [], []>} : vector<8x32xbf16>, vector<32x128xbf16>, vector<8x128xf32> -> vector<8x128xf32>
    %198 = vector.broadcast %65 : vector<1x128xf32> to vector<8x128xf32>
    %199 = arith.addf %197, %198 : vector<8x128xf32>
    %200 = vector.extract_strided_slice %195 {offsets = [0, 0], sizes = [8, 32], strides = [1, 1]} : vector<8x128xf32> to vector<8x32xf32>
    %201 = vector.extract_strided_slice %199 {offsets = [0, 0], sizes = [8, 32], strides = [1, 1]} : vector<8x128xf32> to vector<8x32xf32>
    %202 = arith.addf %200, %201 : vector<8x32xf32>
    %203 = arith.negf %202 : vector<8x32xf32>
    %204 = math.exp %203 : vector<8x32xf32>
    %cst_65 = arith.constant 1.000000e+00 : f32
    %205 = vector.broadcast %cst_65 : f32 to vector<8x32xf32>
    %206 = arith.addf %205, %204 : vector<8x32xf32>
    %207 = arith.divf %205, %206 : vector<8x32xf32>
    %208 = vector.extract_strided_slice %195 {offsets = [0, 32], sizes = [8, 32], strides = [1, 1]} : vector<8x128xf32> to vector<8x32xf32>
    %209 = vector.extract_strided_slice %199 {offsets = [0, 32], sizes = [8, 32], strides = [1, 1]} : vector<8x128xf32> to vector<8x32xf32>
    %210 = arith.addf %208, %209 : vector<8x32xf32>
    %211 = arith.negf %210 : vector<8x32xf32>
    %212 = math.exp %211 : vector<8x32xf32>
    %cst_66 = arith.constant 1.000000e+00 : f32
    %213 = vector.broadcast %cst_66 : f32 to vector<8x32xf32>
    %214 = arith.addf %213, %212 : vector<8x32xf32>
    %215 = arith.divf %213, %214 : vector<8x32xf32>
    %216 = vector.extract_strided_slice %195 {offsets = [0, 64], sizes = [8, 32], strides = [1, 1]} : vector<8x128xf32> to vector<8x32xf32>
    %217 = vector.extract_strided_slice %199 {offsets = [0, 64], sizes = [8, 32], strides = [1, 1]} : vector<8x128xf32> to vector<8x32xf32>
    %218 = arith.mulf %207, %217 : vector<8x32xf32>
    %219 = arith.addf %216, %218 : vector<8x32xf32>
    %220 = math.tanh %219 : vector<8x32xf32>
    %cst_67 = arith.constant 1.000000e+00 : f32
    %221 = vector.broadcast %cst_67 : f32 to vector<8x32xf32>
    %222 = arith.subf %221, %215 : vector<8x32xf32>
    %223 = arith.mulf %222, %220 : vector<8x32xf32>
    %224 = arith.mulf %215, %193 : vector<8x32xf32>
    %225 = arith.addf %223, %224 : vector<8x32xf32>
    %c32_68 = arith.constant 32 : index
    %c0_69 = arith.constant 0 : index
    %226 = vector.load %arg7[%c32_68, %c0_69] : memref<64x32xf32, #tpu.memory_space<vmem>>, vector<8x32xf32>
    tpu.vector_store %arg7[%c32_68, %c0_69], %225 {strides = array<i32>} : memref<64x32xf32, #tpu.memory_space<vmem>>, vector<8x32xf32>,
    %c40_70 = arith.constant 40 : index
    %c0_71 = arith.constant 0 : index
    %227 = vector.load %arg6[%c40_70, %c0_71] : memref<64x128xf32, #tpu.memory_space<vmem>>, vector<8x128xf32>
    %228 = arith.truncf %225 : vector<8x32xf32> to vector<8x32xbf16>
    %cst_72 = arith.constant dense<0.000000e+00> : vector<8x128xf32>
    %229 = tpu.matmul %228, %64, %cst_72 {dimension_numbers = #tpu.dot_dimension_numbers<[1], [0], [0], [1], [0, 0, 1, 1], [], []>} : vector<8x32xbf16>, vector<32x128xbf16>, vector<8x128xf32> -> vector<8x128xf32>
    %230 = vector.broadcast %65 : vector<1x128xf32> to vector<8x128xf32>
    %231 = arith.addf %229, %230 : vector<8x128xf32>
    %232 = vector.extract_strided_slice %227 {offsets = [0, 0], sizes = [8, 32], strides = [1, 1]} : vector<8x128xf32> to vector<8x32xf32>
    %233 = vector.extract_strided_slice %231 {offsets = [0, 0], sizes = [8, 32], strides = [1, 1]} : vector<8x128xf32> to vector<8x32xf32>
    %234 = arith.addf %232, %233 : vector<8x32xf32>
    %235 = arith.negf %234 : vector<8x32xf32>
    %236 = math.exp %235 : vector<8x32xf32>
    %cst_73 = arith.constant 1.000000e+00 : f32
    %237 = vector.broadcast %cst_73 : f32 to vector<8x32xf32>
    %238 = arith.addf %237, %236 : vector<8x32xf32>
    %239 = arith.divf %237, %238 : vector<8x32xf32>
    %240 = vector.extract_strided_slice %227 {offsets = [0, 32], sizes = [8, 32], strides = [1, 1]} : vector<8x128xf32> to vector<8x32xf32>
    %241 = vector.extract_strided_slice %231 {offsets = [0, 32], sizes = [8, 32], strides = [1, 1]} : vector<8x128xf32> to vector<8x32xf32>
    %242 = arith.addf %240, %241 : vector<8x32xf32>
    %243 = arith.negf %242 : vector<8x32xf32>
    %244 = math.exp %243 : vector<8x32xf32>
    %cst_74 = arith.constant 1.000000e+00 : f32
    %245 = vector.broadcast %cst_74 : f32 to vector<8x32xf32>
    %246 = arith.addf %245, %244 : vector<8x32xf32>
    %247 = arith.divf %245, %246 : vector<8x32xf32>
    %248 = vector.extract_strided_slice %227 {offsets = [0, 64], sizes = [8, 32], strides = [1, 1]} : vector<8x128xf32> to vector<8x32xf32>
    %249 = vector.extract_strided_slice %231 {offsets = [0, 64], sizes = [8, 32], strides = [1, 1]} : vector<8x128xf32> to vector<8x32xf32>
    %250 = arith.mulf %239, %249 : vector<8x32xf32>
    %251 = arith.addf %248, %250 : vector<8x32xf32>
    %252 = math.tanh %251 : vector<8x32xf32>
    %cst_75 = arith.constant 1.000000e+00 : f32
    %253 = vector.broadcast %cst_75 : f32 to vector<8x32xf32>
    %254 = arith.subf %253, %247 : vector<8x32xf32>
    %255 = arith.mulf %254, %252 : vector<8x32xf32>
    %256 = arith.mulf %247, %225 : vector<8x32xf32>
    %257 = arith.addf %255, %256 : vector<8x32xf32>
    %c40_76 = arith.constant 40 : index
    %c0_77 = arith.constant 0 : index
    %258 = vector.load %arg7[%c40_76, %c0_77] : memref<64x32xf32, #tpu.memory_space<vmem>>, vector<8x32xf32>
    tpu.vector_store %arg7[%c40_76, %c0_77], %257 {strides = array<i32>} : memref<64x32xf32, #tpu.memory_space<vmem>>, vector<8x32xf32>,
    %c48 = arith.constant 48 : index
    %c0_78 = arith.constant 0 : index
    %259 = vector.load %arg6[%c48, %c0_78] : memref<64x128xf32, #tpu.memory_space<vmem>>, vector<8x128xf32>
    %260 = arith.truncf %257 : vector<8x32xf32> to vector<8x32xbf16>
    %cst_79 = arith.constant dense<0.000000e+00> : vector<8x128xf32>
    %261 = tpu.matmul %260, %64, %cst_79 {dimension_numbers = #tpu.dot_dimension_numbers<[1], [0], [0], [1], [0, 0, 1, 1], [], []>} : vector<8x32xbf16>, vector<32x128xbf16>, vector<8x128xf32> -> vector<8x128xf32>
    %262 = vector.broadcast %65 : vector<1x128xf32> to vector<8x128xf32>
    %263 = arith.addf %261, %262 : vector<8x128xf32>
    %264 = vector.extract_strided_slice %259 {offsets = [0, 0], sizes = [8, 32], strides = [1, 1]} : vector<8x128xf32> to vector<8x32xf32>
    %265 = vector.extract_strided_slice %263 {offsets = [0, 0], sizes = [8, 32], strides = [1, 1]} : vector<8x128xf32> to vector<8x32xf32>
    %266 = arith.addf %264, %265 : vector<8x32xf32>
    %267 = arith.negf %266 : vector<8x32xf32>
    %268 = math.exp %267 : vector<8x32xf32>
    %cst_80 = arith.constant 1.000000e+00 : f32
    %269 = vector.broadcast %cst_80 : f32 to vector<8x32xf32>
    %270 = arith.addf %269, %268 : vector<8x32xf32>
    %271 = arith.divf %269, %270 : vector<8x32xf32>
    %272 = vector.extract_strided_slice %259 {offsets = [0, 32], sizes = [8, 32], strides = [1, 1]} : vector<8x128xf32> to vector<8x32xf32>
    %273 = vector.extract_strided_slice %263 {offsets = [0, 32], sizes = [8, 32], strides = [1, 1]} : vector<8x128xf32> to vector<8x32xf32>
    %274 = arith.addf %272, %273 : vector<8x32xf32>
    %275 = arith.negf %274 : vector<8x32xf32>
    %276 = math.exp %275 : vector<8x32xf32>
    %cst_81 = arith.constant 1.000000e+00 : f32
    %277 = vector.broadcast %cst_81 : f32 to vector<8x32xf32>
    %278 = arith.addf %277, %276 : vector<8x32xf32>
    %279 = arith.divf %277, %278 : vector<8x32xf32>
    %280 = vector.extract_strided_slice %259 {offsets = [0, 64], sizes = [8, 32], strides = [1, 1]} : vector<8x128xf32> to vector<8x32xf32>
    %281 = vector.extract_strided_slice %263 {offsets = [0, 64], sizes = [8, 32], strides = [1, 1]} : vector<8x128xf32> to vector<8x32xf32>
    %282 = arith.mulf %271, %281 : vector<8x32xf32>
    %283 = arith.addf %280, %282 : vector<8x32xf32>
    %284 = math.tanh %283 : vector<8x32xf32>
    %cst_82 = arith.constant 1.000000e+00 : f32
    %285 = vector.broadcast %cst_82 : f32 to vector<8x32xf32>
    %286 = arith.subf %285, %279 : vector<8x32xf32>
    %287 = arith.mulf %286, %284 : vector<8x32xf32>
    %288 = arith.mulf %279, %257 : vector<8x32xf32>
    %289 = arith.addf %287, %288 : vector<8x32xf32>
    %c48_83 = arith.constant 48 : index
    %c0_84 = arith.constant 0 : index
    %290 = vector.load %arg7[%c48_83, %c0_84] : memref<64x32xf32, #tpu.memory_space<vmem>>, vector<8x32xf32>
    tpu.vector_store %arg7[%c48_83, %c0_84], %289 {strides = array<i32>} : memref<64x32xf32, #tpu.memory_space<vmem>>, vector<8x32xf32>,
    %c56 = arith.constant 56 : index
    %c0_85 = arith.constant 0 : index
    %291 = vector.load %arg6[%c56, %c0_85] : memref<64x128xf32, #tpu.memory_space<vmem>>, vector<8x128xf32>
    %292 = arith.truncf %289 : vector<8x32xf32> to vector<8x32xbf16>
    %cst_86 = arith.constant dense<0.000000e+00> : vector<8x128xf32>
    %293 = tpu.matmul %292, %64, %cst_86 {dimension_numbers = #tpu.dot_dimension_numbers<[1], [0], [0], [1], [0, 0, 1, 1], [], []>} : vector<8x32xbf16>, vector<32x128xbf16>, vector<8x128xf32> -> vector<8x128xf32>
    %294 = vector.broadcast %65 : vector<1x128xf32> to vector<8x128xf32>
    %295 = arith.addf %293, %294 : vector<8x128xf32>
    %296 = vector.extract_strided_slice %291 {offsets = [0, 0], sizes = [8, 32], strides = [1, 1]} : vector<8x128xf32> to vector<8x32xf32>
    %297 = vector.extract_strided_slice %295 {offsets = [0, 0], sizes = [8, 32], strides = [1, 1]} : vector<8x128xf32> to vector<8x32xf32>
    %298 = arith.addf %296, %297 : vector<8x32xf32>
    %299 = arith.negf %298 : vector<8x32xf32>
    %300 = math.exp %299 : vector<8x32xf32>
    %cst_87 = arith.constant 1.000000e+00 : f32
    %301 = vector.broadcast %cst_87 : f32 to vector<8x32xf32>
    %302 = arith.addf %301, %300 : vector<8x32xf32>
    %303 = arith.divf %301, %302 : vector<8x32xf32>
    %304 = vector.extract_strided_slice %291 {offsets = [0, 32], sizes = [8, 32], strides = [1, 1]} : vector<8x128xf32> to vector<8x32xf32>
    %305 = vector.extract_strided_slice %295 {offsets = [0, 32], sizes = [8, 32], strides = [1, 1]} : vector<8x128xf32> to vector<8x32xf32>
    %306 = arith.addf %304, %305 : vector<8x32xf32>
    %307 = arith.negf %306 : vector<8x32xf32>
    %308 = math.exp %307 : vector<8x32xf32>
    %cst_88 = arith.constant 1.000000e+00 : f32
    %309 = vector.broadcast %cst_88 : f32 to vector<8x32xf32>
    %310 = arith.addf %309, %308 : vector<8x32xf32>
    %311 = arith.divf %309, %310 : vector<8x32xf32>
    %312 = vector.extract_strided_slice %291 {offsets = [0, 64], sizes = [8, 32], strides = [1, 1]} : vector<8x128xf32> to vector<8x32xf32>
    %313 = vector.extract_strided_slice %295 {offsets = [0, 64], sizes = [8, 32], strides = [1, 1]} : vector<8x128xf32> to vector<8x32xf32>
    %314 = arith.mulf %303, %313 : vector<8x32xf32>
    %315 = arith.addf %312, %314 : vector<8x32xf32>
    %316 = math.tanh %315 : vector<8x32xf32>
    %cst_89 = arith.constant 1.000000e+00 : f32
    %317 = vector.broadcast %cst_89 : f32 to vector<8x32xf32>
    %318 = arith.subf %317, %311 : vector<8x32xf32>
    %319 = arith.mulf %318, %316 : vector<8x32xf32>
    %320 = arith.mulf %311, %289 : vector<8x32xf32>
    %321 = arith.addf %319, %320 : vector<8x32xf32>
    %c56_90 = arith.constant 56 : index
    %c0_91 = arith.constant 0 : index
    %322 = vector.load %arg7[%c56_90, %c0_91] : memref<64x32xf32, #tpu.memory_space<vmem>>, vector<8x32xf32>
    tpu.vector_store %arg7[%c56_90, %c0_91], %321 {strides = array<i32>} : memref<64x32xf32, #tpu.memory_space<vmem>>, vector<8x32xf32>,
    %c288 = arith.constant 288 : index
    %c0_92 = arith.constant 0 : index
    %323 = vector.load %arg4[%c288, %c0_92] : memref<320x128xbf16, #tpu.memory_space<vmem>>, vector<32x128xbf16>
    %c216 = arith.constant 216 : index
    %c0_93 = arith.constant 0 : index
    %324 = vector.load %arg3[%c216, %c0_93] : memref<224x128xf32, #tpu.memory_space<vmem>>, vector<1x128xf32>
    %c0_94 = arith.constant 0 : index
    %c0_95 = arith.constant 0 : index
    %325 = vector.load %arg7[%c0_94, %c0_95] : memref<64x32xf32, #tpu.memory_space<vmem>>, vector<64x32xf32>
    %326 = arith.truncf %325 : vector<64x32xf32> to vector<64x32xbf16>
    %cst_96 = arith.constant dense<0.000000e+00> : vector<64x128xf32>
    %327 = tpu.matmul %326, %323, %cst_96 {dimension_numbers = #tpu.dot_dimension_numbers<[1], [0], [0], [1], [0, 0, 1, 1], [], []>} : vector<64x32xbf16>, vector<32x128xbf16>, vector<64x128xf32> -> vector<64x128xf32>
    %328 = vector.broadcast %324 : vector<1x128xf32> to vector<64x128xf32>
    %329 = arith.addf %327, %328 : vector<64x128xf32>
    %c0_97 = arith.constant 0 : index
    %c0_98 = arith.constant 0 : index
    %330 = vector.load %arg5[%c0_97, %c0_98] : memref<64x128xf32, #tpu.memory_space<vmem>>, vector<64x128xf32>
    tpu.vector_store %arg5[%c0_97, %c0_98], %329 {strides = array<i32>} : memref<64x128xf32, #tpu.memory_space<vmem>>, vector<64x128xf32>,
    return
  }
}

</mosaic_0001>

<bundles_post_ra>
// kernel: image_captioning_forward.1
= control target key start
LH: loop header
LB: loop body
LE: loop exit
PB: predicated region body
PF: predicated region fallthrough
CT: control target
= control target key end

     0   :  { %vm95_vm0 = vcmask 326656   ;;  %vm2856_vm1 = vmmov 0   ;;  %s2861_s24 = smov 96   ;;  %vm1338_vm14 = vcmask 261120   ;;  %s3664_s3 = inlined_call_operand.vmem [shape: f32[224,128], index: 3, kind: input, shape index: {}]   ;;  %s3665_s0 = inlined_call_operand.vmem [shape: f32[512,40], index: 0, kind: input, shape index: {}]   ;;  %s3666_s1 = inlined_call_operand.vmem [shape: f32[8,512], index: 1, kind: input, shape index: {}]   ;;  %s3667_s2 = inlined_call_operand.vmem [shape: s32[56,1], index: 2, kind: input, shape index: {}]   ;;  %s3668_s4 = inlined_call_operand.vmem [shape: bf16[320,128], index: 4, kind: input, shape index: {}]   ;;  %s3669_s5 = inlined_call_operand.vmem [shape: f32[64,128], index: 5, kind: output, shape index: {}]  }
   0x1   :  { %v21_v0 = vld [vmem:[%s3664_s3] sm:$0xff]  ;;  %v22_v1 = vld [vmem:[%s3664_s3 + $0x8] sm:$0xff]  ;;  %v23_v2 = vld [vmem:[%s3664_s3 + $0x10] sm:$0xff] }
   0x2   :  { %v2680_v3 = vpack.c.bf16 %v22_v1, %v21_v0  ;;  %v24_v4 = vld [vmem:[%s3664_s3 + $0x18] sm:$0xff]  ;;  %v27_v5 = vld [vmem:[%s3665_s0] sm:$0xff]  ;;  %v28_v8 = vld [vmem:[%s3665_s0 + $0x8] sm:$0xff] }
   0x3   :  { %v2684_v6 = vpack.c.bf16 %v24_v4, %v23_v2  ;;  %2429 = vmatprep.mubr.msk.f32.mxu0 %vm95_vm0, %v27_v5  ;;  %v25_v7 = vld [vmem:[%s3664_s3 + $0x20] sm:$0xff]  ;;  %v29_v9 = vld [vmem:[%s3665_s0 + $0x10] sm:$0xff]  ;;  %v30_v10 = vld [vmem:[%s3665_s0 + $0x18] sm:$0xff] }
   0x4   :  { %2681 = vmatprep.subr.bf16.mxu0 %v2680_v3  ;;  %v31_v11 = vld [vmem:[%s3665_s0 + $0x20] sm:$0xff]  ;;  %v32_v12 = vld [vmem:[%s3665_s0 + $0x28] sm:$0xff]  ;;  %v33_v13 = vld [vmem:[%s3665_s0 + $0x30] sm:$0xff] }
   0x5   :  { %2683 = vmatpush3.bf16.msra.mxu0 %v2680_v3  ;;  %v34_v14 = vld [vmem:[%s3665_s0 + $0x38] sm:$0xff]  ;;  %v35_v15 = vld [vmem:[%s3665_s0 + $0x40] sm:$0xff]  ;;  %v36_v16 = vld [vmem:[%s3665_s0 + $0x48] sm:$0xff] }
   0x6   :  { %2685 = vmatprep.subr.bf16.mxu0 %v2684_v6  ;;  %v37_v17 = vld [vmem:[%s3665_s0 + $0x50] sm:$0xff]  ;;  %v38_v18 = vld [vmem:[%s3665_s0 + $0x58] sm:$0xff]  ;;  %v39_v19 = vld [vmem:[%s3665_s0 + $0x60] sm:$0xff] }
   0x7   :  { %v40_v20 = vld [vmem:[%s3665_s0 + $0x68] sm:$0xff]  ;;  %v41_v21 = vld [vmem:[%s3665_s0 + $0x70] sm:$0xff]  ;;  %v42_v22 = vld [vmem:[%s3665_s0 + $0x78] sm:$0xff] }
   0x8   :  { %v43_v23 = vld [vmem:[%s3665_s0 + $0x80] sm:$0xff]  ;;  %v44_v24 = vld [vmem:[%s3665_s0 + $0x88] sm:$0xff]  ;;  %v45_v25 = vld [vmem:[%s3665_s0 + $0x90] sm:$0xff] }
   0x9   :  { %2687 = vmatpush3.bf16.msra.mxu0 %v2684_v6  ;;  %v46_v26 = vld [vmem:[%s3665_s0 + $0x98] sm:$0xff]  ;;  %v47_v27 = vld [vmem:[%s3665_s0 + $0xa0] sm:$0xff]  ;;  %v48_v28 = vld [vmem:[%s3665_s0 + $0xa8] sm:$0xff] }
   0xa   :  { %2427 = vmatprep.subr.mxu0 %v25_v7  ;;  %v49_v29 = vld [vmem:[%s3665_s0 + $0xb0] sm:$0xff]  ;;  %v50_v30 = vld [vmem:[%s3665_s0 + $0xb8] sm:$0xff]  ;;  %v51_v31 = vld [vmem:[%s3665_s0 + $0xc0] sm:$0xff] }
   0xb   :  { %v52_v32 = vld [vmem:[%s3665_s0 + $0xc8] sm:$0xff]  ;;  %v53_v33 = vld [vmem:[%s3665_s0 + $0xd0] sm:$0xff]  ;;  %v54_v34 = vld [vmem:[%s3665_s0 + $0xd8] sm:$0xff] }
   0xc   :  { %v55_v35 = vld [vmem:[%s3665_s0 + $0xe0] sm:$0xff]  ;;  %v56_v36 = vld [vmem:[%s3665_s0 + $0xe8] sm:$0xff]  ;;  %v57_v37 = vld [vmem:[%s3665_s0 + $0xf0] sm:$0xff] }
   0xd   :  { %2428 = vmatpush3.msra.mxu0 %v25_v7  ;;  %v58_v38 = vld [vmem:[%s3665_s0 + $0xf8] sm:$0xff]  ;;  %v59_v39 = vld [vmem:[%s3665_s0 + $0x100] sm:$0xff]  ;;  %v60_v40 = vld [vmem:[%s3665_s0 + $0x108] sm:$0xff] }
   0xe   :  { %2430 = vmatmul.mubr.msk.f32.vlgmr.msra.gmra.mrb[0].mxu0 %vm95_vm0, %v28_v8  ;;  %v61_v41 = vld [vmem:[%s3665_s0 + $0x110] sm:$0xff]  ;;  %v62_v42 = vld [vmem:[%s3665_s0 + $0x118] sm:$0xff]  ;;  %v63_v43 = vld [vmem:[%s3665_s0 + $0x120] sm:$0xff] }
   0xf   :  { %2432 = vmatprep.mubr.msk.f32.mxu0 %vm95_vm0, %v29_v9  ;;  %v64_v44 = vld [vmem:[%s3665_s0 + $0x128] sm:$0xff]  ;;  %v65_v45 = vld [vmem:[%s3665_s0 + $0x130] sm:$0xff]  ;;  %v66_v46 = vld [vmem:[%s3665_s0 + $0x138] sm:$0xff] }
  0x10   :  { %v67_v47 = vld [vmem:[%s3665_s0 + $0x140] sm:$0xff]  ;;  %v68_v48 = vld [vmem:[%s3665_s0 + $0x148] sm:$0xff]  ;;  %v69_v49 = vld [vmem:[%s3665_s0 + $0x150] sm:$0xff] }
  0x11   :  { %v70_v50 = vld [vmem:[%s3665_s0 + $0x158] sm:$0xff]  ;;  %v71_v51 = vld [vmem:[%s3665_s0 + $0x160] sm:$0xff]  ;;  %v72_v52 = vld [vmem:[%s3665_s0 + $0x168] sm:$0xff] }
  0x12   :  { %2433 = vmatmul.mubr.msk.f32.gmra.mrb[2].mxu0 %vm95_vm0, %v30_v10  ;;  %v73_v53 = vld [vmem:[%s3665_s0 + $0x170] sm:$0xff]  ;;  %v74_v54 = vld [vmem:[%s3665_s0 + $0x178] sm:$0xff]  ;;  %v75_v55 = vld [vmem:[%s3665_s0 + $0x180] sm:$0xff] }
  0x13   :  { %2435 = vmatprep.mubr.msk.f32.mxu0 %vm95_vm0, %v31_v11  ;;  %v76_v56 = vld [vmem:[%s3665_s0 + $0x188] sm:$0xff]  ;;  %v77_v57 = vld [vmem:[%s3665_s0 + $0x190] sm:$0xff]  ;;  %v78_v58 = vld [vmem:[%s3665_s0 + $0x198] sm:$0xff] }
  0x14   :  { %v79_v59 = vld [vmem:[%s3665_s0 + $0x1a0] sm:$0xff]  ;;  %v80_v60 = vld [vmem:[%s3665_s0 + $0x1a8] sm:$0xff]  ;;  %v81_v61 = vld [vmem:[%s3665_s0 + $0x1b0] sm:$0xff] }
  0x15   :  { %v82_v62 = vld [vmem:[%s3665_s0 + $0x1b8] sm:$0xff]  ;;  %v83_v63 = vld [vmem:[%s3665_s0 + $0x1c0] sm:$0xff]  ;;  %v84_v0 = vld [vmem:[%s3665_s0 + $0x1c8] sm:$0xff] }
  0x16   :  { %2436 = vmatmul.mubr.msk.f32.gmra.mrb[4].mxu0 %vm95_vm0, %v32_v12  ;;  %v85_v1 = vld [vmem:[%s3665_s0 + $0x1d0] sm:$0xff]  ;;  %v86_v2 = vld [vmem:[%s3665_s0 + $0x1d8] sm:$0xff]  ;;  %v87_v3 = vld [vmem:[%s3665_s0 + $0x1e0] sm:$0xff] }
  0x17   :  { %2438 = vmatprep.mubr.msk.f32.mxu0 %vm95_vm0, %v33_v13  ;;  %v88_v4 = vld [vmem:[%s3665_s0 + $0x1e8] sm:$0xff]  ;;  %v89_v5 = vld [vmem:[%s3665_s0 + $0x1f0] sm:$0xff]  ;;  %v90_v6 = vld [vmem:[%s3665_s0 + $0x1f8] sm:$0xff] }
  0x18   :  { %v738_v7 = vld [vmem:[%s3666_s1 + $0x8] sm:$0xff] }
  0x19   :  { %805 = vmatprep.mubr.f32.mxu1 %v738_v7  ;;  %v3169_v8 = vld [vmem:[%s3664_s3 + $0xa8] ss:$0 sm:$0xff] }
  0x1a   :  { %2439 = vmatmul.mubr.msk.f32.gmra.mrb[6].mxu0 %vm95_vm0, %v34_v14 }
  0x1b   :  { %2441 = vmatprep.mubr.msk.f32.mxu0 %vm95_vm0, %v35_v15 }
  0x1e   :  { %2442 = vmatmul.mubr.msk.f32.gmra.mrb[8].mxu0 %vm95_vm0, %v36_v16 }
  0x1f   :  { %2444 = vmatprep.mubr.msk.f32.mxu0 %vm95_vm0, %v37_v17 }
  0x22   :  { %2445 = vmatmul.mubr.msk.f32.gmra.mrb[10].mxu0 %vm95_vm0, %v38_v18 }
  0x23   :  { %2447 = vmatprep.mubr.msk.f32.mxu0 %vm95_vm0, %v39_v19 }
  0x26   :  { %2448 = vmatmul.mubr.msk.f32.gmra.mrb[12].mxu0 %vm95_vm0, %v40_v20 }
  0x27   :  { %2450 = vmatprep.mubr.msk.f32.mxu0 %vm95_vm0, %v41_v21 }
  0x2a   :  { %2451 = vmatmul.mubr.msk.f32.gmra.mrb[14].mxu0 %vm95_vm0, %v42_v22 }
  0x2b   :  { %2453 = vmatprep.mubr.msk.f32.mxu0 %vm95_vm0, %v43_v23 }
  0x2e   :  { %2454 = vmatmul.mubr.msk.f32.gmra.mrb[16].mxu0 %vm95_vm0, %v44_v24 }
  0x2f   :  { %2456 = vmatprep.mubr.msk.f32.mxu0 %vm95_vm0, %v45_v25 }
  0x32   :  { %2457 = vmatmul.mubr.msk.f32.gmra.mrb[18].mxu0 %vm95_vm0, %v46_v26 }
  0x33   :  { %2459 = vmatprep.mubr.msk.f32.mxu0 %vm95_vm0, %v47_v27 }
  0x36   :  { %2460 = vmatmul.mubr.msk.f32.gmra.mrb[20].mxu0 %vm95_vm0, %v48_v28 }
  0x37   :  { %2462 = vmatprep.mubr.msk.f32.mxu0 %vm95_vm0, %v49_v29 }
  0x3a   :  { %2463 = vmatmul.mubr.msk.f32.gmra.mrb[22].mxu0 %vm95_vm0, %v50_v30 }
  0x3b   :  { %2465 = vmatprep.mubr.msk.f32.mxu0 %vm95_vm0, %v51_v31 }
  0x3e   :  { %2466 = vmatmul.mubr.msk.f32.gmra.mrb[24].mxu0 %vm95_vm0, %v52_v32 }
  0x3f   :  { %2468 = vmatprep.mubr.msk.f32.mxu0 %vm95_vm0, %v53_v33 }
  0x42   :  { %2469 = vmatmul.mubr.msk.f32.gmra.mrb[26].mxu0 %vm95_vm0, %v54_v34 }
  0x43   :  { %2471 = vmatprep.mubr.msk.f32.mxu0 %vm95_vm0, %v55_v35 }
  0x46   :  { %2472 = vmatmul.mubr.msk.f32.gmra.mrb[28].mxu0 %vm95_vm0, %v56_v36 }
  0x47   :  { %2474 = vmatprep.mubr.msk.f32.mxu0 %vm95_vm0, %v57_v37 }
  0x4a   :  { %2475 = vmatmul.mubr.msk.f32.gmra.mrb[30].mxu0 %vm95_vm0, %v58_v38 }
  0x4b   :  { %2477 = vmatprep.mubr.msk.f32.mxu0 %vm95_vm0, %v59_v39 }
  0x4e   :  { %2478 = vmatmul.mubr.msk.f32.gmra.mrb[32].mxu0 %vm95_vm0, %v60_v40 }
  0x4f   :  { %2480 = vmatprep.mubr.msk.f32.mxu0 %vm95_vm0, %v61_v41 }
  0x52   :  { %2481 = vmatmul.mubr.msk.f32.gmra.mrb[34].mxu0 %vm95_vm0, %v62_v42 }
  0x53   :  { %2483 = vmatprep.mubr.msk.f32.mxu0 %vm95_vm0, %v63_v43 }
  0x56   :  { %2484 = vmatmul.mubr.msk.f32.gmra.mrb[36].mxu0 %vm95_vm0, %v64_v44 }
  0x57   :  { %2486 = vmatprep.mubr.msk.f32.mxu0 %vm95_vm0, %v65_v45 }
  0x5a   :  { %2487 = vmatmul.mubr.msk.f32.gmra.mrb[38].mxu0 %vm95_vm0, %v66_v46 }
  0x5b   :  { %2489 = vmatprep.mubr.msk.f32.mxu0 %vm95_vm0, %v67_v47 }
  0x5e   :  { %2490 = vmatmul.mubr.msk.f32.gmra.mrb[40].mxu0 %vm95_vm0, %v68_v48 }
  0x5f   :  { %2492 = vmatprep.mubr.msk.f32.mxu0 %vm95_vm0, %v69_v49 }
  0x62   :  { %2493 = vmatmul.mubr.msk.f32.gmra.mrb[42].mxu0 %vm95_vm0, %v70_v50 }
  0x63   :  { %2495 = vmatprep.mubr.msk.f32.mxu0 %vm95_vm0, %v71_v51 }
  0x66   :  { %2496 = vmatmul.mubr.msk.f32.gmra.mrb[44].mxu0 %vm95_vm0, %v72_v52 }
  0x67   :  { %2498 = vmatprep.mubr.msk.f32.mxu0 %vm95_vm0, %v73_v53 }
  0x6a   :  { %2499 = vmatmul.mubr.msk.f32.gmra.mrb[46].mxu0 %vm95_vm0, %v74_v54 }
  0x6b   :  { %2501 = vmatprep.mubr.msk.f32.mxu0 %vm95_vm0, %v75_v55 }
  0x6e   :  { %2502 = vmatmul.mubr.msk.f32.gmra.mrb[48].mxu0 %vm95_vm0, %v76_v56 }
  0x6f   :  { %2504 = vmatprep.mubr.msk.f32.mxu0 %vm95_vm0, %v77_v57 }
  0x72   :  { %2505 = vmatmul.mubr.msk.f32.gmra.mrb[50].mxu0 %vm95_vm0, %v78_v58 }
  0x73   :  { %2507 = vmatprep.mubr.msk.f32.mxu0 %vm95_vm0, %v79_v59 }
  0x76   :  { %2508 = vmatmul.mubr.msk.f32.gmra.mrb[52].mxu0 %vm95_vm0, %v80_v60 }
  0x77   :  { %2510 = vmatprep.mubr.msk.f32.mxu0 %vm95_vm0, %v81_v61 }
  0x7a   :  { %2511 = vmatmul.mubr.msk.f32.gmra.mrb[54].mxu0 %vm95_vm0, %v82_v62 }
  0x7b   :  { %2513 = vmatprep.mubr.msk.f32.mxu0 %vm95_vm0, %v83_v63 }
  0x7e   :  { %2514 = vmatmul.mubr.msk.f32.gmra.mrb[56].mxu0 %vm95_vm0, %v84_v0 }
  0x7f   :  { %2516 = vmatprep.mubr.msk.f32.mxu0 %vm95_vm0, %v85_v1 }
  0x82   :  { %2517 = vmatmul.mubr.msk.f32.gmra.mrb[58].mxu0 %vm95_vm0, %v86_v2 }
  0x83   :  { %2519 = vmatprep.mubr.msk.f32.mxu0 %vm95_vm0, %v87_v3 }
  0x86   :  { %2520 = vmatmul.mubr.msk.f32.gmra.mrb[60].mxu0 %vm95_vm0, %v88_v4 }
  0x87   :  { %2522 = vmatprep.mubr.msk.f32.mxu0 %vm95_vm0, %v89_v5 }
  0x8a   :  { %2523 = vmatmul.mubr.msk.f32.gmra.mrb[62].mxu0 %vm95_vm0, %v90_v6 }
  0xe1   :  { %v2431_v9 = vpop.f32.mrb[0].mxu0 }
  0xe2   :  { %v360_v10 = vadd.f32 %v2431_v9, %v3169_v8  ;;  %v354_v11 = vpop.f32.mrb[1].mxu0 }
  0xe3   :  { %v355_v12 = vadd.f32 %v3169_v8, %v354_v11 }
  0xe4   :  { %v674_v13 = vmax.f32 %v360_v10, 0.0 }
  0xe5   :  { %v673_v14 = vmax.f32 %v355_v12, 0.0  ;;  %v2434_v15 = vpop.f32.mrb[2].mxu0 }
  0xe6   :  { %v370_v16 = vadd.f32 %v2434_v15, %v3169_v8  ;;  %v364_v17 = vpop.f32.mrb[3].mxu0 }
  0xe7   :  { %v365_v18 = vadd.f32 %v3169_v8, %v364_v17  ;;  %v2690_v19 = vpack.c.bf16 %v674_v13, %v673_v14 }
  0xe8   :  { %v676_v20 = vmax.f32 %v370_v16, 0.0 }
  0xe9   :  { %v675_v21 = vmax.f32 %v365_v18, 0.0  ;;  %v2437_v22 = vpop.f32.mrb[4].mxu0 }
  0xea   :  { %v380_v23 = vadd.f32 %v2437_v22, %v3169_v8  ;;  %v374_v24 = vpop.f32.mrb[5].mxu0 }
  0xeb   :  { %v3176_v25 = vpack.c.bf16 %v676_v20, %v675_v21  ;;  %v375_v26 = vadd.f32 %v3169_v8, %v374_v24 }
  0xec   :  { %v678_v27 = vmax.f32 %v380_v23, 0.0 }
  0xed   :  { %v677_v28 = vmax.f32 %v375_v26, 0.0  ;;  %v2440_v29 = vpop.f32.mrb[6].mxu0 }
  0xee   :  { %v390_v30 = vadd.f32 %v2440_v29, %v3169_v8  ;;  %v384_v31 = vpop.f32.mrb[7].mxu0 }
  0xef   :  { %v3180_v32 = vpack.c.bf16 %v678_v27, %v677_v28  ;;  %v385_v33 = vadd.f32 %v3169_v8, %v384_v31 }
  0xf0   :  { %v680_v34 = vmax.f32 %v390_v30, 0.0 }
  0xf1   :  { %v679_v35 = vmax.f32 %v385_v33, 0.0  ;;  %v2443_v36 = vpop.f32.mrb[8].mxu0 }
  0xf2   :  { %v400_v37 = vadd.f32 %v2443_v36, %v3169_v8  ;;  %v394_v38 = vpop.f32.mrb[9].mxu0 }
  0xf3   :  { %v3184_v39 = vpack.c.bf16 %v680_v34, %v679_v35  ;;  %v395_v40 = vadd.f32 %v3169_v8, %v394_v38 }
  0xf4   :  { %v682_v41 = vmax.f32 %v400_v37, 0.0 }
  0xf5   :  { %v681_v42 = vmax.f32 %v395_v40, 0.0  ;;  %v2446_v43 = vpop.f32.mrb[10].mxu0 }
  0xf6   :  { %v410_v44 = vadd.f32 %v2446_v43, %v3169_v8  ;;  %v404_v45 = vpop.f32.mrb[11].mxu0 }
  0xf7   :  { %v3188_v46 = vpack.c.bf16 %v682_v41, %v681_v42  ;;  %v405_v47 = vadd.f32 %v3169_v8, %v404_v45 }
  0xf8   :  { %v684_v48 = vmax.f32 %v410_v44, 0.0 }
  0xf9   :  { %v683_v49 = vmax.f32 %v405_v47, 0.0  ;;  %v2449_v50 = vpop.f32.mrb[12].mxu0 }
  0xfa   :  { %v420_v51 = vadd.f32 %v2449_v50, %v3169_v8  ;;  %v414_v52 = vpop.f32.mrb[13].mxu0 }
  0xfb   :  { %v3192_v53 = vpack.c.bf16 %v684_v48, %v683_v49  ;;  %v415_v54 = vadd.f32 %v3169_v8, %v414_v52 }
  0xfc   :  { %v686_v55 = vmax.f32 %v420_v51, 0.0 }
  0xfd   :  { %v685_v56 = vmax.f32 %v415_v54, 0.0  ;;  %v2452_v57 = vpop.f32.mrb[14].mxu0 }
  0xfe   :  { %v430_v58 = vadd.f32 %v2452_v57, %v3169_v8  ;;  %v424_v59 = vpop.f32.mrb[15].mxu0 }
  0xff   :  { %v3196_v60 = vpack.c.bf16 %v686_v55, %v685_v56  ;;  %v425_v61 = vadd.f32 %v3169_v8, %v424_v59 }
 0x100   :  { %v688_v62 = vmax.f32 %v430_v58, 0.0 }
 0x101   :  { %v687_v63 = vmax.f32 %v425_v61, 0.0  ;;  %v2455_v0 = vpop.f32.mrb[16].mxu0 }
 0x102   :  { %v440_v1 = vadd.f32 %v2455_v0, %v3169_v8  ;;  %v434_v2 = vpop.f32.mrb[17].mxu0 }
 0x103   :  { %v3200_v3 = vpack.c.bf16 %v688_v62, %v687_v63  ;;  %v435_v4 = vadd.f32 %v3169_v8, %v434_v2 }
 0x104   :  { %v690_v5 = vmax.f32 %v440_v1, 0.0 }
 0x105   :  { %v689_v6 = vmax.f32 %v435_v4, 0.0  ;;  %v2458_v7 = vpop.f32.mrb[18].mxu0 }
 0x106   :  { %v450_v9 = vadd.f32 %v2458_v7, %v3169_v8  ;;  %v444_v10 = vpop.f32.mrb[19].mxu0  ;;  %v740_v7 = vld [vmem:[%s3666_s1 + $0x18] sm:$0xff] }
 0x107   :  { %v445_v11 = vadd.f32 %v3169_v8, %v444_v10  ;;  %v2688_v12 = vpack.c.bf16 %v690_v5, %v689_v6  ;;  %v737_v5 = vld [vmem:[%s3666_s1] sm:$0xff] }
 0x108   :  { %v692_v13 = vmax.f32 %v450_v9, 0.0 }
 0x109   :  { %v691_v14 = vmax.f32 %v445_v11, 0.0  ;;  %v2461_v15 = vpop.f32.mrb[20].mxu0  ;;  %2689 = vmatprep.subr.bf16.mxu1 %v2688_v12 }
 0x10a   :  { %v460_v16 = vadd.f32 %v2461_v15, %v3169_v8  ;;  %v454_v17 = vpop.f32.mrb[21].mxu0  ;;  %2691 = vmatpush3.bf16.msra.mxu1 %v2690_v19 }
 0x10b   :  { %v2692_v18 = vpack.c.bf16 %v692_v13, %v691_v14  ;;  %v455_v20 = vadd.f32 %v3169_v8, %v454_v17 }
 0x10c   :  { %v694_v21 = vmax.f32 %v460_v16, 0.0 }
 0x10d   :  { %v693_v22 = vmax.f32 %v455_v20, 0.0  ;;  %v2464_v23 = vpop.f32.mrb[22].mxu0  ;;  %2693 = vmatprep.subr.bf16.mxu1 %v2692_v18 }
 0x10e   :  { %v470_v24 = vadd.f32 %v2464_v23, %v3169_v8  ;;  %v464_v26 = vpop.f32.mrb[23].mxu0  ;;  %2695 = vmatpush3.bf16.msra.mxu1 %v3176_v25 }
 0x10f   :  { %v2696_v27 = vpack.c.bf16 %v694_v21, %v693_v22  ;;  %v465_v28 = vadd.f32 %v3169_v8, %v464_v26 }
 0x110   :  { %v696_v29 = vmax.f32 %v470_v24, 0.0 }
 0x111   :  { %v695_v30 = vmax.f32 %v465_v28, 0.0  ;;  %v2467_v31 = vpop.f32.mrb[24].mxu0  ;;  %2697 = vmatprep.subr.bf16.mxu1 %v2696_v27 }
 0x112   :  { %v480_v19 = vadd.f32 %v2467_v31, %v3169_v8  ;;  %v474_v33 = vpop.f32.mrb[25].mxu0  ;;  %2699 = vmatpush3.bf16.msra.mxu1 %v3180_v32 }
 0x113   :  { %v2700_v34 = vpack.c.bf16 %v696_v29, %v695_v30  ;;  %v475_v35 = vadd.f32 %v3169_v8, %v474_v33 }
 0x114   :  { %v698_v36 = vmax.f32 %v480_v19, 0.0 }
 0x115   :  { %v697_v37 = vmax.f32 %v475_v35, 0.0  ;;  %v2470_v38 = vpop.f32.mrb[26].mxu0  ;;  %2701 = vmatprep.subr.bf16.mxu1 %v2700_v34 }
 0x116   :  { %v490_v25 = vadd.f32 %v2470_v38, %v3169_v8  ;;  %v484_v40 = vpop.f32.mrb[27].mxu0  ;;  %2703 = vmatpush3.bf16.msra.mxu1 %v3184_v39 }
 0x117   :  { %v2704_v41 = vpack.c.bf16 %v698_v36, %v697_v37  ;;  %v485_v42 = vadd.f32 %v3169_v8, %v484_v40 }
 0x118   :  { %v700_v43 = vmax.f32 %v490_v25, 0.0 }
 0x119   :  { %v699_v44 = vmax.f32 %v485_v42, 0.0  ;;  %v2473_v45 = vpop.f32.mrb[28].mxu0  ;;  %2705 = vmatprep.subr.bf16.mxu1 %v2704_v41 }
 0x11a   :  { %v500_v32 = vadd.f32 %v2473_v45, %v3169_v8  ;;  %v494_v47 = vpop.f32.mrb[29].mxu0  ;;  %2707 = vmatpush3.bf16.msra.mxu1 %v3188_v46 }
 0x11b   :  { %v2708_v48 = vpack.c.bf16 %v700_v43, %v699_v44  ;;  %v495_v49 = vadd.f32 %v3169_v8, %v494_v47 }
 0x11c   :  { %v702_v50 = vmax.f32 %v500_v32, 0.0 }
 0x11d   :  { %v701_v51 = vmax.f32 %v495_v49, 0.0  ;;  %v2476_v52 = vpop.f32.mrb[30].mxu0  ;;  %2709 = vmatprep.subr.bf16.mxu1 %v2708_v48 }
 0x11e   :  { %v510_v39 = vadd.f32 %v2476_v52, %v3169_v8  ;;  %v504_v54 = vpop.f32.mrb[31].mxu0  ;;  %2711 = vmatpush3.bf16.msra.mxu1 %v3192_v53 }
 0x11f   :  { %v2712_v55 = vpack.c.bf16 %v702_v50, %v701_v51  ;;  %v505_v56 = vadd.f32 %v3169_v8, %v504_v54 }
 0x120   :  { %v704_v57 = vmax.f32 %v510_v39, 0.0 }
 0x121   :  { %v703_v58 = vmax.f32 %v505_v56, 0.0  ;;  %v2479_v59 = vpop.f32.mrb[32].mxu0  ;;  %2713 = vmatprep.subr.bf16.mxu1 %v2712_v55 }
 0x122   :  { %v520_v46 = vadd.f32 %v2479_v59, %v3169_v8  ;;  %v514_v61 = vpop.f32.mrb[33].mxu0  ;;  %2715 = vmatpush3.bf16.msra.mxu1 %v3196_v60 }
 0x123   :  { %v2716_v62 = vpack.c.bf16 %v704_v57, %v703_v58  ;;  %v515_v63 = vadd.f32 %v3169_v8, %v514_v61 }
 0x124   :  { %v706_v0 = vmax.f32 %v520_v46, 0.0 }
 0x125   :  { %v705_v1 = vmax.f32 %v515_v63, 0.0  ;;  %v2482_v2 = vpop.f32.mrb[34].mxu0  ;;  %2717 = vmatprep.subr.bf16.mxu1 %v2716_v62 }
 0x126   :  { %v530_v53 = vadd.f32 %v2482_v2, %v3169_v8  ;;  %v524_v4 = vpop.f32.mrb[35].mxu0  ;;  %2719 = vmatpush3.bf16.msra.mxu1 %v3200_v3 }
 0x127   :  { %v3230_v6 = vpack.c.bf16 %v706_v0, %v705_v1  ;;  %v525_v60 = vadd.f32 %v3169_v8, %v524_v4 }
 0x128   :  { %v708_v9 = vmax.f32 %v530_v53, 0.0 }
 0x129   :  { %v707_v10 = vmax.f32 %v525_v60, 0.0  ;;  %v2485_v11 = vpop.f32.mrb[36].mxu0  ;;  %806 = vmatmul.mubr.f32.vlgmr.msra.gmra.mrb[0].mxu1 %v737_v5 }
 0x12a   :  { %v540_v12 = vadd.f32 %v2485_v11, %v3169_v8  ;;  %v534_v13 = vpop.f32.mrb[37].mxu0  ;;  %875 = vmatprep.mubr.f32.mxu1 %v740_v7 }
 0x12b   :  { %v3237_v3 = vpack.c.bf16 %v708_v9, %v707_v10  ;;  %v535_v14 = vadd.f32 %v3169_v8, %v534_v13 }
 0x12c   :  { %v710_v15 = vmax.f32 %v540_v12, 0.0 }
 0x12d   :  { %v709_v16 = vmax.f32 %v535_v14, 0.0  ;;  %v2488_v17 = vpop.f32.mrb[38].mxu0 }
 0x12e   :  { %v550_v18 = vadd.f32 %v2488_v17, %v3169_v8  ;;  %v544_v20 = vpop.f32.mrb[39].mxu0 }
 0x12f   :  { %v3241_v21 = vpack.c.bf16 %v710_v15, %v709_v16  ;;  %v545_v22 = vadd.f32 %v3169_v8, %v544_v20 }
 0x130   :  { %v712_v23 = vmax.f32 %v550_v18, 0.0 }
 0x131   :  { %v711_v24 = vmax.f32 %v545_v22, 0.0  ;;  %v2491_v26 = vpop.f32.mrb[40].mxu0 }
 0x132   :  { %v560_v27 = vadd.f32 %v2491_v26, %v3169_v8  ;;  %v554_v28 = vpop.f32.mrb[41].mxu0 }
 0x133   :  { %v3245_v29 = vpack.c.bf16 %v712_v23, %v711_v24  ;;  %v555_v30 = vadd.f32 %v3169_v8, %v554_v28 }
 0x134   :  { %v714_v31 = vmax.f32 %v560_v27, 0.0 }
 0x135   :  { %v713_v19 = vmax.f32 %v555_v30, 0.0  ;;  %v2494_v33 = vpop.f32.mrb[42].mxu0 }
 0x136   :  { %v570_v34 = vadd.f32 %v2494_v33, %v3169_v8  ;;  %v564_v35 = vpop.f32.mrb[43].mxu0 }
 0x137   :  { %v3249_v36 = vpack.c.bf16 %v714_v31, %v713_v19  ;;  %v565_v37 = vadd.f32 %v3169_v8, %v564_v35 }
 0x138   :  { %v716_v38 = vmax.f32 %v570_v34, 0.0 }
 0x139   :  { %v715_v25 = vmax.f32 %v565_v37, 0.0  ;;  %v2497_v40 = vpop.f32.mrb[44].mxu0 }
 0x13a   :  { %v580_v41 = vadd.f32 %v2497_v40, %v3169_v8  ;;  %v574_v42 = vpop.f32.mrb[45].mxu0 }
 0x13b   :  { %v3253_v43 = vpack.c.bf16 %v716_v38, %v715_v25  ;;  %v575_v44 = vadd.f32 %v3169_v8, %v574_v42 }
 0x13c   :  { %v718_v45 = vmax.f32 %v580_v41, 0.0 }
 0x13d   :  { %v717_v32 = vmax.f32 %v575_v44, 0.0  ;;  %v2500_v47 = vpop.f32.mrb[46].mxu0 }
 0x13e   :  { %v590_v48 = vadd.f32 %v2500_v47, %v3169_v8  ;;  %v584_v49 = vpop.f32.mrb[47].mxu0 }
 0x13f   :  { %v3257_v50 = vpack.c.bf16 %v718_v45, %v717_v32  ;;  %v585_v51 = vadd.f32 %v3169_v8, %v584_v49  ;;  %v739_v49 = vld [vmem:[%s3666_s1 + $0x10] sm:$0xff] }
 0x140   :  { %v720_v52 = vmax.f32 %v590_v48, 0.0 }
 0x141   :  { %v719_v39 = vmax.f32 %v585_v51, 0.0  ;;  %v2503_v54 = vpop.f32.mrb[48].mxu0  ;;  %v2855_v51 = vmov 0.0|0.0  }
 0x142   :  { %v600_v55 = vadd.f32 %v2503_v54, %v3169_v8  ;;  %v594_v56 = vpop.f32.mrb[49].mxu0 }
 0x143   :  { %v3261_v57 = vpack.c.bf16 %v720_v52, %v719_v39  ;;  %v595_v58 = vadd.f32 %v3169_v8, %v594_v56  ;;  %v884_v39 = vld [vmem:[%s3664_s3 + $0x40] sm:$0xff]  ;;  %v886_v56 = vld [vmem:[%s3664_s3 + $0x50] sm:$0xff] }
 0x144   :  { %v722_v59 = vmax.f32 %v600_v55, 0.0  ;;  %v885_v55 = vld [vmem:[%s3664_s3 + $0x48] sm:$0xff] }
 0x145   :  { %v721_v46 = vmax.f32 %v595_v58, 0.0  ;;  %v2506_v61 = vpop.f32.mrb[50].mxu0  ;;  %v887_v58 = vld [vmem:[%s3664_s3 + $0x58] sm:$0xff] }
 0x146   :  { %v610_v62 = vadd.f32 %v2506_v61, %v3169_v8  ;;  %v604_v63 = vpop.f32.mrb[51].mxu0  ;;  %v889_v61 = vld [vmem:[%s3664_s3 + $0x68] sm:$0xff] }
 0x147   :  { %v2720_v0 = vpack.c.bf16 %v722_v59, %v721_v46  ;;  %v605_v1 = vadd.f32 %v3169_v8, %v604_v63  ;;  %v888_v59 = vld [vmem:[%s3664_s3 + $0x60] sm:$0xff] }
 0x148   :  { %v724_v2 = vmax.f32 %v610_v62, 0.0  ;;  %v2762_v46 = vpack.c.bf16 %v888_v59, %v887_v58  ;;  %v890_v62 = vld [vmem:[%s3664_s3 + $0x70] sm:$0xff] }
 0x149   :  { %v723_v53 = vmax.f32 %v605_v1, 0.0  ;;  %v2509_v4 = vpop.f32.mrb[52].mxu0  ;;  %2721 = vmatprep.subr.bf16.mxu1 %v2720_v0  ;;  %v2765_v63 = vpack.c.bf16 %v890_v62, %v889_v61  ;;  %v891_v0 = vld [vmem:[%s3664_s3 + $0x78] sm:$0xff]  ;;  %v892_v1 = vld [vmem:[%s3664_s3 + $0x80] sm:$0xff] }
 0x14a   :  { %v620_v5 = vadd.f32 %v2509_v4, %v3169_v8  ;;  %v614_v60 = vpop.f32.mrb[53].mxu0  ;;  %2723 = vmatpush3.bf16.msra.mxu1 %v3230_v6  ;;  %v894_v4 = vld [vmem:[%s3664_s3 + $0x90] sm:$0xff] }
 0x14b   :  { %v2724_v7 = vpack.c.bf16 %v724_v2, %v723_v53  ;;  %v615_v9 = vadd.f32 %v3169_v8, %v614_v60  ;;  %v2768_v2 = vpack.c.bf16 %v892_v1, %v891_v0  ;;  %v893_v53 = vld [vmem:[%s3664_s3 + $0x88] sm:$0xff]  ;;  %v895_v60 = vld [vmem:[%s3664_s3 + $0x98] sm:$0xff] }
 0x14c   :  { %v726_v10 = vmax.f32 %v620_v5, 0.0  ;;  %v2771_v5 = vpack.c.bf16 %v894_v4, %v893_v53 }
 0x14d   :  { %v725_v11 = vmax.f32 %v615_v9, 0.0  ;;  %v2512_v12 = vpop.f32.mrb[54].mxu0  ;;  %2725 = vmatprep.subr.bf16.mxu1 %v2724_v7  ;;  %v896_v7 = vld [vmem:[%s3664_s3 + $0xa0] sm:$0xff] }
 0x14e   :  { %v630_v13 = vadd.f32 %v2512_v12, %v3169_v8  ;;  %v624_v14 = vpop.f32.mrb[55].mxu0  ;;  %2727 = vmatpush3.bf16.msra.mxu1 %v3237_v3  ;;  %v2774_v9 = vpack.c.bf16 %v896_v7, %v895_v60  ;;  %v1142_v12 = vld [vmem:[%s3667_s2] sm:$0xff] }
 0x14f   :  { %v2728_v15 = vpack.c.bf16 %v726_v10, %v725_v11  ;;  %v625_v16 = vadd.f32 %v3169_v8, %v624_v14  ;;  %v2857_v10 = vmov 0.0   ;;  %v2858_v11 = vmov 0   ;;  %v1143_v14 = vld [vmem:[%s3667_s2 + $0x8] sm:$0xff] }
 0x150   :  { %v728_v17 = vmax.f32 %v630_v13, 0.0  ;;  %2783 = vset.pattern.permute.xlu0 %v2858_v11  ;;  %2784 = vset.pattern.permute.xlu1 %v2858_v11  ;;  %v1144_v13 = vld [vmem:[%s3667_s2 + $0x10] sm:$0xff] }
 0x151   :  { %v727_v18 = vmax.f32 %v625_v16, 0.0  ;;  %v2515_v20 = vpop.f32.mrb[56].mxu0  ;;  %2729 = vmatprep.subr.bf16.mxu1 %v2728_v15  ;;  %1152 = vperm.xlu0 %2783, %v1142_v12   ;;  %v1145_v15 = vld [vmem:[%s3667_s2 + $0x18] sm:$0xff]  ;;  %v2785_v16 = vld [vmem:[%s3668_s4 + $0x40] sm:$0xff]  }
 0x152   :  { %v640_v6 = vadd.f32 %v2515_v20, %v3169_v8  ;;  %v634_v22 = vpop.f32.mrb[57].mxu0  ;;  %2731 = vmatpush3.bf16.msra.mxu1 %v3241_v21  ;;  %1158 = vperm.xlu1 %2784, %v1144_v13   ;;  %v1147_v20 = vld [vmem:[%s3667_s2 + $0x28] sm:$0xff] }
 0x153   :  { %v2732_v23 = vpack.c.bf16 %v728_v17, %v727_v18  ;;  %v635_v24 = vadd.f32 %v3169_v8, %v634_v22  ;;  %v2786_v17 = vld [vmem:[%s3668_s4 + $0x48] sm:$0xff]   ;;  %v1146_v18 = vld [vmem:[%s3667_s2 + $0x20] sm:$0xff]  ;;  %2580 = vmatprep.subr.bf16.mxu0 %v2785_v16  ;;  %v1148_v22 = vld [vmem:[%s3667_s2 + $0x30] sm:$0xff]  ;;  %s2860_s2 = smov 64  }
 0x154   :  { %v730_v26 = vmax.f32 %v640_v6, 0.0  ;;  %2581 = vmatpush3.bf16.msra.mxu0 %v2785_v16  ;;  %v2787_v6 = vld [vmem:[%s3668_s4 + $0x50] sm:$0xff]  }
 0x155   :  { %v729_v27 = vmax.f32 %v635_v24, 0.0  ;;  %v2518_v28 = vpop.f32.mrb[58].mxu0  ;;  %2733 = vmatprep.subr.bf16.mxu1 %v2732_v23  ;;  %1155 = vperm.xlu0 %2783, %v1143_v14   ;;  %v2788_v23 = vld [vmem:[%s3668_s4 + $0x58] sm:$0xff]   ;;  %v2789_v24 = vld [vmem:[%s3668_s4 + $0x60] sm:$0xff]  }
 0x156   :  { %v650_v3 = vadd.f32 %v2518_v28, %v3169_v8  ;;  %v644_v30 = vpop.f32.mrb[59].mxu0  ;;  %2735 = vmatpush3.bf16.msra.mxu1 %v3245_v29  ;;  %1161 = vperm.xlu1 %2784, %v1145_v15   ;;  %v2792_v28 = vld [vmem:[%s3668_s4 + $0x78] sm:$0xff]  }
 0x157   :  { %v2736_v31 = vpack.c.bf16 %v730_v26, %v729_v27  ;;  %v645_v19 = vadd.f32 %v3169_v8, %v644_v30  ;;  %2582 = vmatprep.subr.bf16.mxu0 %v2786_v17  ;;  %v2790_v26 = vld [vmem:[%s3668_s4 + $0x68] sm:$0xff]   ;;  %v2791_v27 = vld [vmem:[%s3668_s4 + $0x70] sm:$0xff]  }
 0x158   :  { %v732_v33 = vmax.f32 %v650_v3, 0.0  ;;  %2583 = vmatpush3.bf16.msra.mxu0 %v2786_v17 }
 0x159   :  { %v731_v34 = vmax.f32 %v645_v19, 0.0  ;;  %v2521_v35 = vpop.f32.mrb[60].mxu0  ;;  %2737 = vmatprep.subr.bf16.mxu1 %v2736_v31  ;;  %1164 = vperm.xlu0 %2783, %v1146_v18   ;;  %v3467_v18 = vld [vmem:[%s3664_s3 + $0xd0] ss:$0 sm:$0xff] }
 0x15a   :  { %v660_v21 = vadd.f32 %v2521_v35, %v3169_v8  ;;  %v654_v37 = vpop.f32.mrb[61].mxu0  ;;  %2739 = vmatpush3.bf16.msra.mxu1 %v3249_v36  ;;  %1167 = vperm.xlu1 %2784, %v1147_v20   ;;  %v976_v35 = vlaneseq }
 0x15b   :  { %v2740_v38 = vpack.c.bf16 %v732_v33, %v731_v34  ;;  %v655_v25 = vadd.f32 %v3169_v8, %v654_v37  ;;  %2584 = vmatprep.subr.bf16.mxu0 %v2787_v6 }
 0x15c   :  { %v734_v40 = vmax.f32 %v660_v21, 0.0  ;;  %2585 = vmatpush3.bf16.msra.mxu0 %v2787_v6  ;;  %v1150_v37 = vand.u32 127, %v976_v35  ;;  %v977_v58 = vshrl.u32 %v976_v35, 7  ;;  %v2153_v35 = vld [vmem:[%s3664_s3 + $0xb8] ss:$0 sm:$0xff] }
 0x15d   :  { %v733_v41 = vmax.f32 %v655_v25, 0.0  ;;  %v2524_v42 = vpop.f32.mrb[62].mxu0  ;;  %2741 = vmatprep.subr.bf16.mxu1 %v2740_v38  ;;  %1170 = vperm.xlu0 %2783, %v1148_v22  }
 0x15e   :  { %v670_v29 = vadd.f32 %v2524_v42, %v3169_v8  ;;  %v664_v44 = vpop.f32.mrb[63].mxu0  ;;  %2743 = vmatpush3.bf16.msra.mxu1 %v3253_v43  ;;  %v881_v43 = vld [vmem:[%s3664_s3 + $0x28] sm:$0xff]  ;;  %2586 = vmatprep.subr.bf16.mxu0 %v2788_v23  ;;  %v3394_v42 = vld [vmem:[%s3668_s4 + $0x80] sm:$0xff]   ;;  %v978_v61 = vsub.s32 0, %v977_v58  ;;  %vm988_vm13 = vcmp.lt.s32.totalorder %v977_v58, 2 }
 0x15f   :  { %v2744_v45 = vpack.c.bf16 %v734_v40, %v733_v41  ;;  %v665_v32 = vadd.f32 %v3169_v8, %v664_v44  ;;  %v882_v8 = vld [vmem:[%s3664_s3 + $0x30] sm:$0xff] }
 0x160   :  { %v736_v47 = vmax.f32 %v670_v29, 0.0  ;;  %v2753_v52 = vpack.c.bf16 %v882_v8, %v881_v43  ;;  %2587 = vmatpush3.bf16.msra.mxu0 %v2788_v23  ;;  %v2859_v29 = vmov 1.0|1.0   ;;  %v2798_v43 = vld [vmem:[%s3668_s4 + $0x18] sm:$0xff]   ;;  %v2799_v8 = vld [vmem:[%s3668_s4 + $0x20] sm:$0xff]  }
 0x161   :  { %v735_v48 = vmax.f32 %v665_v32, 0.0  ;;  %2745 = vmatprep.subr.bf16.mxu1 %v2744_v45  ;;  %2588 = vmatprep.subr.bf16.mxu0 %v2789_v24  ;;  %v3400_v32 = vld [vmem:[%s3668_s4 + $0x88] sm:$0xff]  }
 0x162   :  { %2747 = vmatpush3.bf16.msra.mxu1 %v3257_v50  ;;  %v883_v50 = vld [vmem:[%s3664_s3 + $0x38] sm:$0xff] }
 0x163   :  { %v2748_v36 = vpack.c.bf16 %v736_v47, %v735_v48  ;;  %v2756_v54 = vpack.c.bf16 %v884_v39, %v883_v50  ;;  %v2795_v48 = vld [vmem:[%s3668_s4] sm:$0xff]   ;;  %v2800_v50 = vld [vmem:[%s3668_s4 + $0x28] sm:$0xff]  }
 0x164   :  { %2589 = vmatpush3.bf16.msra.mxu0 %v2789_v24 }
 0x165   :  { %2749 = vmatprep.subr.bf16.mxu1 %v2748_v36  ;;  %2590 = vmatprep.subr.bf16.mxu0 %v2790_v26  ;;  %v2796_v36 = vld [vmem:[%s3668_s4 + $0x8] sm:$0xff]  }
 0x166   :  { %2751 = vmatpush3.bf16.msra.mxu1 %v3261_v57  ;;  %v2759_v57 = vpack.c.bf16 %v886_v56, %v885_v55 }
 0x167   :  { %2752 = vmatprep.subr.bf16.mxu1 %v2855_v51 }
 0x168   :  { %2591 = vmatpush3.bf16.msra.mxu0 %v2790_v26 }
 0x169   :  { %876 = vmatmul.mubr.f32.vlgmr.msra.gmra.mrb[2].mxu1 %v739_v49  ;;  %2592 = vmatprep.subr.bf16.mxu0 %v2791_v27  ;;  %v2797_v49 = vld [vmem:[%s3668_s4 + $0x10] sm:$0xff]  }
 0x16a   :  { %2754 = vmatpush3.bf16.msra.mxu1 %v2753_v52  ;;  %2557 = vmatprep.mubr.msk.f32.mxu1 %vm2856_vm1, %v2857_v10  ;;  %v2802_v52 = vld [vmem:[%s3668_s4 + $0x38] sm:$0xff]  }
 0x16b   :  { %2755 = vmatprep.subr.bf16.mxu1 %v2855_v51 }
 0x16c   :  { %2593 = vmatpush3.bf16.msra.mxu0 %v2791_v27 }
 0x16d   :  { %2594 = vmatprep.subr.bf16.mxu0 %v2792_v28 }
 0x16e   :  { %2757 = vmatpush3.bf16.msra.mxu1 %v2756_v54 }
 0x16f   :  { %2758 = vmatprep.subr.bf16.mxu1 %v2855_v51 }
 0x170   :  { %2595 = vmatpush3.bf16.msra.mxu0 %v2792_v28 }
 0x171   :  { %2604 = vmatprep.subr.bf16.mxu0 %v2857_v10 }
 0x172   :  { %2760 = vmatpush3.bf16.msra.mxu1 %v2759_v57 }
 0x173   :  { %2761 = vmatprep.subr.bf16.mxu1 %v2855_v51 }
 0x176   :  { %2763 = vmatpush3.bf16.msra.mxu1 %v2762_v46 }
 0x177   :  { %2764 = vmatprep.subr.bf16.mxu1 %v2855_v51 }
 0x17a   :  { %2766 = vmatpush3.bf16.msra.mxu1 %v2765_v63  ;;  %v897_v63 = vld [vmem:[%s3664_s3 + $0xb0] sm:$0x1] }
 0x17b   :  { %2767 = vmatprep.subr.bf16.mxu1 %v2855_v51 }
 0x17e   :  { %2769 = vmatpush3.bf16.msra.mxu1 %v2768_v2 }
 0x17f   :  { %2770 = vmatprep.subr.bf16.mxu1 %v2855_v51 }
 0x182   :  { %2772 = vmatpush3.bf16.msra.mxu1 %v2771_v5  ;;  %v979_v5 = vrot.slane %v897_v63, %v978_v61 }
 0x183   :  { %2773 = vmatprep.subr.bf16.mxu1 %v2855_v51  ;;  %v2801_v51 = vld [vmem:[%s3668_s4 + $0x30] sm:$0xff]  }
 0x186   :  { %2775 = vmatpush3.bf16.msra.mxu1 %v2774_v9 }
 0x187   :  { %2560 = vmatprep.subr.bf16.mxu1 %v2857_v10 }
 0x1d0   :  { %v1153_v38 = vpop.permute.xlu0 %1152 }
 0x1d1   :  { %v1159_v25 = vpop.permute.xlu1 %1158  ;;  %vm1172_vm2 = vcmp.eq.s32.totalorder %v1153_v38, %v1150_v37 }
 0x1d2   :  { %vm1174_vm3 = vcmp.eq.s32.totalorder %v1159_v25, %v1150_v37 }
 0x1d4   :  { %v1156_v40 = vpop.permute.xlu0 %1155 }
 0x1d5   :  { %v1162_v41 = vpop.permute.xlu1 %1161  ;;  %vm1173_vm4 = vcmp.eq.s32.totalorder %v1156_v40, %v1150_v37 }
 0x1d6   :  { %vm1175_vm5 = vcmp.eq.s32.totalorder %v1162_v41, %v1150_v37  ;;  %vm2179_vm6 = vmpackc.low %vm1173_vm4, %vm1172_vm2  ;;  %v3486_v41 = vld [vmem:[%s3664_s3 + $0xc8] ss:$0 sm:$0xff] }
 0x1d7   :  { %vm2181_vm7 = vmpackc.low %vm1175_vm5, %vm1174_vm3  ;;  %2596 = vmatprep.mubr.msk.bf16.mxu0 %vm2179_vm6, %v2859_v29 }
 0x1d8   :  { %2597 = vmatmul.mubr.msk.bf16.vlgmr.msra.gmra.mrb[64].mxu0 %vm2181_vm7, %v2859_v29  ;;  %v1165_v44 = vpop.permute.xlu0 %1164 }
 0x1d9   :  { %v1168_v45 = vpop.permute.xlu1 %1167  ;;  %vm1176_vm8 = vcmp.eq.s32.totalorder %v1165_v44, %v1150_v37  ;;  %2605 = vmatpush3.bf16.msra.mxu0 %v3394_v42 }
 0x1da   :  { %vm1177_vm9 = vcmp.eq.s32.totalorder %v1168_v45, %v1150_v37  ;;  %2606 = vmatprep.subr.bf16.mxu0 %v2857_v10 }
 0x1db   :  { %vm2183_vm10 = vmpackc.low %vm1177_vm9, %vm1176_vm8 }
 0x1dc   :  { %2600 = vmatprep.mubr.msk.bf16.mxu0 %vm2183_vm10, %v2859_v29  ;;  %v1171_v47 = vpop.permute.xlu0 %1170 }
 0x1dd   :  { %vm1178_vm11 = vcmp.eq.s32.totalorder %v1171_v47, %v1150_v37  ;;  %2607 = vmatpush3.bf16.msra.mxu0 %v3400_v32  ;;  %v2154_v37 = vld [vmem:[%s3664_s3 + $0xc0] ss:$0 sm:$0xff] }
 0x1de   :  { %vm2185_vm12 = vmpackc.low %vm1178_vm11, %vm1178_vm11  ;;  %2628 = vmatprep.subr.bf16.mxu0 %v2857_v10 }
 0x1e0   :  { %2601 = vmatmul.mubr.msk.bf16.gmra.mrb[68].mxu0 %vm2185_vm12, %v2859_v29 }
 0x1e1   :  { %2608 = vmatprep.mubr.msk.bf16.mxu0 %vm2856_vm1, %v2857_v10 }
 0x1e8   :  { %2609 = vmatmul.mubr.bf16.vlgmr.msra.gmra.mrb[72].mxu0 %v2858_v11 }
 0x1e9   :  { %2629 = vmatpush3.bf16.msra.mxu0 %v3394_v42  ;;  %2632 = vmatprep.mubr.msk.bf16.mxu0 %vm2856_vm1, %v2857_v10 }
 0x1ea   :  { %2630 = vmatprep.subr.bf16.mxu0 %v2857_v10 }
 0x1ed   :  { %2631 = vmatpush3.bf16.msra.mxu0 %v3400_v32 }
 0x1ee   :  { %2644 = vmatprep.subr.bf16.mxu0 %v2857_v10 }
 0x1fc   :  { %v2313_v3 = vpop.f32.mrb[0].mxu1 }
 0x1fd   :  { %v2314_v30 = vpop.f32.mrb[1].mxu1 }
 0x1fe   :  { %v2315_v31 = vadd.f32 %v2314_v30, %v2313_v3 }
 0x23c   :  { %v2348_v19 = vpop.f32.mrb[2].mxu1 }
 0x23d   :  { %v2349_v33 = vpop.f32.mrb[3].mxu1 }
 0x23e   :  { %v2350_v34 = vadd.f32 %v2349_v33, %v2348_v19 }
 0x240   :  { %v878_v21 = vadd.f32 %v2350_v34, %v2315_v31 }
 0x242   :  { %2558 = vmatmul.mubr.f32.vlgmr.msra.gmra.mrb[4].mxu1 %v878_v21 }
 0x243   :  { %2576 = vmatprep.mubr.msk.bf16.mxu1 %vm2856_vm1, %v2857_v10  ;;  %2561 = vmatpush3.bf16.msra.mxu1 %v2795_v48 }
 0x244   :  { %2562 = vmatprep.subr.bf16.mxu1 %v2857_v10 }
 0x247   :  { %2563 = vmatpush3.bf16.msra.mxu1 %v2796_v36 }
 0x248   :  { %2564 = vmatprep.subr.bf16.mxu1 %v2857_v10 }
 0x24b   :  { %2565 = vmatpush3.bf16.msra.mxu1 %v2797_v49 }
 0x24c   :  { %2566 = vmatprep.subr.bf16.mxu1 %v2857_v10 }
 0x24f   :  { %2567 = vmatpush3.bf16.msra.mxu1 %v2798_v43 }
 0x250   :  { %2568 = vmatprep.subr.bf16.mxu1 %v2857_v10 }
 0x253   :  { %2569 = vmatpush3.bf16.msra.mxu1 %v2799_v8 }
 0x254   :  { %2570 = vmatprep.subr.bf16.mxu1 %v2857_v10 }
 0x257   :  { %2571 = vmatpush3.bf16.msra.mxu1 %v2800_v50 }
 0x258   :  { %2572 = vmatprep.subr.bf16.mxu1 %v2857_v10 }
 0x25b   :  { %2573 = vmatpush3.bf16.msra.mxu1 %v2801_v51 }
 0x25c   :  { %2574 = vmatprep.subr.bf16.mxu1 %v2857_v10 }
 0x25f   :  { %2575 = vmatpush3.bf16.msra.mxu1 %v2802_v52 }
 0x260   :  { %2612 = vmatprep.subr.bf16.mxu1 %v2857_v10 }
 0x2ab   :  { %v3447_v62 = vpop.f32.mrb[64].mxu0 }
 0x2ac   :  { %v3452_v0 = vpop.f32.mrb[65].mxu0 }
 0x2ad   :  { %v3454_v2 = vpop.f32.mrb[66].mxu0 }
 0x2ae   :  { %v3456_v53 = vpop.f32.mrb[67].mxu0 }
 0x2b3   :  { %v3458_v11 = vpop.f32.mrb[68].mxu0 }
 0x2b4   :  { %v3460_v12 = vpop.f32.mrb[69].mxu0 }
 0x2b5   :  { %v2603_v14 = vpop.f32.mrb[70].mxu0 }
 0x2b6   :  { %v3462_v15 = vpop.f32.mrb[71].mxu0 }
 0x2bb   :  { %v1376_v6 = vpop.f32.mrb[72].mxu0 }
 0x2bc   :  { %v1377_v23 = vadd.f32 %v3467_v18, %v1376_v6  ;;  %v2610_v24 = vpop.f32.mrb[73].mxu0 }
 0x2bd   :  { %v1379_v26 = vpop.f32.mrb[74].mxu0 }
 0x2be   :  { %v2611_v28 = vpop.f32.mrb[75].mxu0  ;;  %1390 = vrot.lane.b32.xlu1 %v1377_v23, %s2860_s2 }
 0x315   :  { %v964_v39 = vpop.f32.mrb[4].mxu1 }
 0x316   :  { %v968_v54 = vrot.slane %v964_v39, 4  ;;  %v2559_v55 = vpop.f32.mrb[5].mxu1  ;;  %v980_v7 = vadd.f32 %v979_v5, %v964_v39 }
 0x318   :  { %v969_v56 = vadd.f32 %v968_v54, %v964_v39 }
 0x31a   :  { %v970_v57 = vrot.slane %v969_v56, 2 }
 0x31c   :  { %v971_v59 = vadd.f32 %v970_v57, %v969_v56 }
 0x31e   :  { %v972_v46 = vrot.slane %v971_v59, 1 }
 0x320   :  { %v973_v1 = vadd.f32 %v972_v46, %v971_v59 }
 0x322   :  { %v974_v4 = vmul.f32 0.5, %v973_v1 }
 0x324   :  { %v975_v60 = vadd.f32 %v974_v4, %v897_v63 }
 0x326   :  { %v984_v9 = vrot.slane %v975_v60, %v978_v61 }
 0x328   :  { %v985_v13 = vsub.f32 %v980_v7, %v984_v9  ;;  %v1280_v9 = vadd.f32 %v3486_v41, %v3452_v0 }
 0x32a   :  { %v989_v16 = vmul.f32 %v985_v13, %v985_v13 }
 0x32c   :  { %v992_v17 = vsel %vm988_vm13, %v989_v16, 0.0 }
 0x32d   :  { %v993_v20 = vrot.slane %v992_v17, 4 }
 0x32f   :  { %v994_v22 = vadd.f32 %v993_v20, %v992_v17 }
 0x330   :  { %v1391_v50 = vpop.permute.xlu1 %1390 }
 0x331   :  { %v995_v27 = vrot.slane %v994_v22, 2 }
 0x333   :  { %v996_v3 = vadd.f32 %v995_v27, %v994_v22 }
 0x335   :  { %v997_v30 = vrot.slane %v996_v3, 1 }
 0x337   :  { %v998_v31 = vadd.f32 %v997_v30, %v996_v3 }
 0x339   :  { %v999_v19 = vmul.f32 0.5, %v998_v31 }
 0x33b   :  { %v1002_v33 = vadd.f32 1e-05, %v999_v19 }
 0x33d   :  { %2805 = vrsqrt.f32 %v1002_v33 }
 0x347   :  { %v2806_v34 = vpop.eup %2805 }
 0x348   :  { %v1004_v21 = vmul.f32 %v2806_v34, %v985_v13 }
 0x34a   :  { %v1009_v38 = vmul.f32 %v2153_v35, %v1004_v21 }
 0x34c   :  { %v1014_v25 = vadd.f32 %v2154_v37, %v1009_v38  ;;  %v1283_v38 = vadd.f32 %v3486_v41, %v3456_v53 }
 0x34e   :  { %v1032_v40 = vpack.c.bf16 %v1014_v25, %v1014_v25 }
 0x350   :  { %2577 = vmatmul.mubr.bf16.vlgmr.msra.gmra.mrb[8].mxu1 %v1032_v40 }
 0x351   :  { %2613 = vmatpush3.bf16.msra.mxu1 %v3394_v42  ;;  %2616 = vmatprep.mubr.msk.bf16.mxu1 %vm2856_vm1, %v2857_v10 }
 0x352   :  { %2614 = vmatprep.subr.bf16.mxu1 %v2857_v10 }
 0x355   :  { %2615 = vmatpush3.bf16.msra.mxu1 %v3400_v32 }
 0x356   :  { %2620 = vmatprep.subr.bf16.mxu1 %v2857_v10 }
 0x423   :  { %v1119_v29 = vpop.f32.mrb[8].mxu1 }
 0x424   :  { %v1120_v44 = vadd.f32 %v3486_v41, %v1119_v29  ;;  %v2578_v45 = vpop.f32.mrb[9].mxu1 }
 0x425   :  { %v1122_v47 = vpop.f32.mrb[10].mxu1 }
 0x426   :  { %v1382_v48 = vadd.f32 %v1377_v23, %v1120_v44  ;;  %v2579_v36 = vpop.f32.mrb[11].mxu1 }
 0x428   :  { %v2190_v49 = vmul.f32 -1.442695, %v1382_v48 }
 0x42a   :  { %2807 = vpow2.f32 %v2190_v49 }
 0x434   :  { %v2808_v43 = vpop.eup %2807 }
 0x435   :  { %v1386_v8 = vadd.f32 1.0, %v2808_v43 }
 0x437   :  { %2809 = vrcp.f32 %v1386_v8 }
 0x441   :  { %v2810_v51 = vpop.eup %2809 }
 0x442   :  { %v1393_v52 = vmul.f32 %v2810_v51, %v1391_v50  ;;  %v1400_v56 = vsub.f32 1.0, %v2810_v51  ;;  %v1406_v58 = vmul.f32 0.0, %v2810_v51 }
 0x444   :  { %1395 = vrot.lane.b32.xlu0 %v1393_v52, %s2860_s2 }
 0x4b6   :  { %v1396_v39 = vpop.permute.xlu0 %1395 }
 0x4b7   :  { %v1398_v54 = vadd.f32 %v1396_v39, %v1120_v44 }
 0x4b9   :  { %2811 = vtanh.f32 %v1398_v54 }
 0x4c3   :  { %v2812_v55 = vpop.eup %2811 }
 0x4c4   :  { %1402 = vrot.lane.b32.xlu1 %v2812_v55, %s2861_s24 }
 0x536   :  { %v1403_v57 = vpop.permute.xlu1 %1402 }
 0x537   :  { %v1405_v59 = vmul.f32 %v1403_v57, %v1400_v56 }
 0x539   :  { %v3491_v46 = vadd.f32 %v1406_v58, %v1405_v59 }
 0x53b   :  { %v1414_v61 = vpack.c.bf16 %v3491_v46, %v3491_v46 }
 0x53d   :  { %1416 = vrot.lane.b32.xlu0 %v1414_v61, %s2861_s24  ;;  %v1288_v61 = vadd.f32 %v3447_v62, %v3486_v41 }
 0x5af   :  { %v1417_v63 = vpop.permute.xlu0 %1416 }
 0x5b0   :  { %2617 = vmatmul.mubr.msk.bf16.vlgmr.msra.gmra.mrb[12].mxu1 %vm1338_vm14, %v1417_v63 }
 0x5b1   :  { %2621 = vmatpush3.bf16.msra.mxu1 %v3394_v42  ;;  %2624 = vmatprep.mubr.msk.bf16.mxu1 %vm2856_vm1, %v2857_v10 }
 0x5b2   :  { %2622 = vmatprep.subr.bf16.mxu1 %v2857_v10 }
 0x5b5   :  { %2623 = vmatpush3.bf16.msra.mxu1 %v3400_v32 }
 0x5b6   :  { %2636 = vmatprep.subr.bf16.mxu1 %v2857_v10 }
 0x683   :  { %v1455_v1 = vpop.f32.mrb[12].mxu1 }
 0x684   :  { %v1456_v4 = vadd.f32 %v3467_v18, %v1455_v1  ;;  %v2618_v5 = vpop.f32.mrb[13].mxu1 }
 0x685   :  { %v1458_v60 = vpop.f32.mrb[14].mxu1 }
 0x686   :  { %1469 = vrot.lane.b32.xlu1 %v1456_v4, %s2860_s2  ;;  %v2619_v7 = vpop.f32.mrb[15].mxu1  ;;  %v1461_v13 = vadd.f32 %v1456_v4, %v1280_v9 }
 0x688   :  { %v2192_v14 = vmul.f32 -1.442695, %v1461_v13 }
 0x68a   :  { %2813 = vpow2.f32 %v2192_v14 }
 0x694   :  { %v2814_v16 = vpop.eup %2813 }
 0x695   :  { %v1465_v17 = vadd.f32 1.0, %v2814_v16 }
 0x697   :  { %2815 = vrcp.f32 %v1465_v17 }
 0x6a1   :  { %v2816_v20 = vpop.eup %2815 }
 0x6a2   :  { %v1479_v27 = vsub.f32 1.0, %v2816_v20  ;;  %v1485_v0 = vmul.f32 %v2816_v20, %v3491_v46 }
 0x6f8   :  { %v1470_v6 = vpop.permute.xlu1 %1469 }
 0x6f9   :  { %v1472_v22 = vmul.f32 %v2816_v20, %v1470_v6 }
 0x6fb   :  { %1474 = vrot.lane.b32.xlu0 %v1472_v22, %s2860_s2 }
 0x76d   :  { %v1475_v23 = vpop.permute.xlu0 %1474 }
 0x76e   :  { %v1477_v24 = vadd.f32 %v1475_v23, %v1280_v9 }
 0x770   :  { %2817 = vtanh.f32 %v1477_v24 }
 0x77a   :  { %v2818_v26 = vpop.eup %2817 }
 0x77b   :  { %1481 = vrot.lane.b32.xlu1 %v2818_v26, %s2861_s24 }
 0x7ed   :  { %v1482_v28 = vpop.permute.xlu1 %1481 }
 0x7ee   :  { %v1484_v3 = vmul.f32 %v1482_v28, %v1479_v27 }
 0x7f0   :  { %v3510_v30 = vadd.f32 %v1485_v0, %v1484_v3 }
 0x7f2   :  { %v1493_v31 = vpack.c.bf16 %v3510_v30, %v3510_v30 }
 0x7f4   :  { %1495 = vrot.lane.b32.xlu0 %v1493_v31, %s2861_s24  ;;  %v1291_v31 = vadd.f32 %v3454_v2, %v3486_v41 }
 0x866   :  { %v1496_v19 = vpop.permute.xlu0 %1495 }
 0x867   :  { %2625 = vmatmul.mubr.msk.bf16.vlgmr.msra.gmra.mrb[16].mxu1 %vm1338_vm14, %v1496_v19 }
 0x868   :  { %2637 = vmatpush3.bf16.msra.mxu1 %v3394_v42  ;;  %2640 = vmatprep.mubr.msk.bf16.mxu1 %vm2856_vm1, %v2857_v10 }
 0x869   :  { %2638 = vmatprep.subr.bf16.mxu1 %v2857_v10 }
 0x86c   :  { %2639 = vmatpush3.bf16.msra.mxu1 %v3400_v32 }
 0x86d   :  { %2652 = vmatprep.subr.bf16.mxu1 %v2857_v10 }
 0x93a   :  { %v1534_v33 = vpop.f32.mrb[16].mxu1 }
 0x93b   :  { %v1535_v34 = vadd.f32 %v3467_v18, %v1534_v33  ;;  %v2626_v35 = vpop.f32.mrb[17].mxu1 }
 0x93c   :  { %v1537_v21 = vpop.f32.mrb[18].mxu1 }
 0x93d   :  { %1548 = vrot.lane.b32.xlu1 %v1535_v34, %s2860_s2  ;;  %v2627_v37 = vpop.f32.mrb[19].mxu1  ;;  %v1540_v25 = vadd.f32 %v1535_v34, %v1283_v38 }
 0x93f   :  { %v2194_v40 = vmul.f32 -1.442695, %v1540_v25 }
 0x941   :  { %2819 = vpow2.f32 %v2194_v40 }
 0x94b   :  { %v2820_v29 = vpop.eup %2819 }
 0x94c   :  { %v1544_v44 = vadd.f32 1.0, %v2820_v29 }
 0x94e   :  { %2821 = vrcp.f32 %v1544_v44 }
 0x958   :  { %v2822_v45 = vpop.eup %2821 }
 0x959   :  { %v1558_v8 = vsub.f32 1.0, %v2822_v45  ;;  %v1564_v53 = vmul.f32 %v2822_v45, %v3510_v30 }
 0x9af   :  { %v1549_v47 = vpop.permute.xlu1 %1548 }
 0x9b0   :  { %v1551_v48 = vmul.f32 %v2822_v45, %v1549_v47 }
 0x9b2   :  { %1553 = vrot.lane.b32.xlu0 %v1551_v48, %s2860_s2 }
 0xa24   :  { %v1554_v36 = vpop.permute.xlu0 %1553 }
 0xa25   :  { %v1556_v49 = vadd.f32 %v1554_v36, %v1283_v38 }
 0xa27   :  { %2823 = vtanh.f32 %v1556_v49 }
 0xa31   :  { %v2824_v43 = vpop.eup %2823 }
 0xa32   :  { %1560 = vrot.lane.b32.xlu1 %v2824_v43, %s2861_s24 }
 0xaa4   :  { %v1561_v50 = vpop.permute.xlu1 %1560 }
 0xaa5   :  { %v1563_v51 = vmul.f32 %v1561_v50, %v1558_v8 }
 0xaa7   :  { %v3529_v52 = vadd.f32 %v1564_v53, %v1563_v51 }
 0xaa9   :  { %v1572_v39 = vpack.c.bf16 %v3529_v52, %v3529_v52 }
 0xaab   :  { %1574 = vrot.lane.b32.xlu0 %v1572_v39, %s2861_s24  ;;  %v1296_v39 = vadd.f32 %v3486_v41, %v3460_v12 }
 0xb1d   :  { %v1575_v54 = vpop.permute.xlu0 %1574 }
 0xb1e   :  { %2633 = vmatmul.mubr.msk.bf16.vlgmr.msra.gmra.mrb[76].mxu0 %vm1338_vm14, %v1575_v54 }
 0xb1f   :  { %2645 = vmatpush3.bf16.msra.mxu0 %v3394_v42  ;;  %2648 = vmatprep.mubr.msk.bf16.mxu0 %vm2856_vm1, %v2857_v10 }
 0xb20   :  { %2646 = vmatprep.subr.bf16.mxu0 %v2857_v10 }
 0xb23   :  { %2647 = vmatpush3.bf16.msra.mxu0 %v3400_v32 }
 0xb24   :  { %2660 = vmatprep.subr.bf16.mxu0 %v2857_v10 }
 0xbf1   :  { %v1613_v55 = vpop.f32.mrb[76].mxu0 }
 0xbf2   :  { %v1614_v56 = vadd.f32 %v3467_v18, %v1613_v55  ;;  %v2634_v57 = vpop.f32.mrb[77].mxu0 }
 0xbf3   :  { %v1616_v58 = vpop.f32.mrb[78].mxu0 }
 0xbf4   :  { %1627 = vrot.lane.b32.xlu1 %v1614_v56, %s2860_s2  ;;  %v2635_v59 = vpop.f32.mrb[79].mxu0  ;;  %v1619_v63 = vadd.f32 %v1614_v56, %v1288_v61 }
 0xbf6   :  { %v2196_v1 = vmul.f32 -1.442695, %v1619_v63 }
 0xbf8   :  { %2825 = vpow2.f32 %v2196_v1 }
 0xc02   :  { %v2826_v4 = vpop.eup %2825 }
 0xc03   :  { %v1623_v5 = vadd.f32 1.0, %v2826_v4 }
 0xc05   :  { %2827 = vrcp.f32 %v1623_v5 }
 0xc0f   :  { %v2828_v60 = vpop.eup %2827 }
 0xc10   :  { %v1637_v17 = vsub.f32 1.0, %v2828_v60  ;;  %v1643_v62 = vmul.f32 %v2828_v60, %v3529_v52 }
 0xc66   :  { %v1628_v7 = vpop.permute.xlu1 %1627 }
 0xc67   :  { %v1630_v9 = vmul.f32 %v2828_v60, %v1628_v7 }
 0xc69   :  { %1632 = vrot.lane.b32.xlu0 %v1630_v9, %s2860_s2 }
 0xcdb   :  { %v1633_v13 = vpop.permute.xlu0 %1632 }
 0xcdc   :  { %v1635_v14 = vadd.f32 %v1633_v13, %v1288_v61 }
 0xcde   :  { %2829 = vtanh.f32 %v1635_v14 }
 0xce8   :  { %v2830_v16 = vpop.eup %2829 }
 0xce9   :  { %1639 = vrot.lane.b32.xlu1 %v2830_v16, %s2861_s24 }
 0xd5b   :  { %v1640_v20 = vpop.permute.xlu1 %1639 }
 0xd5c   :  { %v1642_v6 = vmul.f32 %v1640_v20, %v1637_v17  ;;  %v1299_v20 = vadd.f32 %v3486_v41, %v3462_v15 }
 0xd5e   :  { %v3548_v22 = vadd.f32 %v1643_v62, %v1642_v6 }
 0xd60   :  { %v1651_v23 = vpack.c.bf16 %v3548_v22, %v3548_v22 }
 0xd62   :  { %1653 = vrot.lane.b32.xlu0 %v1651_v23, %s2861_s24 }
 0xdd4   :  { %v1654_v24 = vpop.permute.xlu0 %1653 }
 0xdd5   :  { %2641 = vmatmul.mubr.msk.bf16.vlgmr.msra.gmra.mrb[20].mxu1 %vm1338_vm14, %v1654_v24 }
 0xdd6   :  { %2653 = vmatpush3.bf16.msra.mxu1 %v3394_v42  ;;  %2656 = vmatprep.mubr.msk.bf16.mxu1 %vm2856_vm1, %v2857_v10 }
 0xdd7   :  { %2654 = vmatprep.subr.bf16.mxu1 %v2857_v10 }
 0xdda   :  { %2655 = vmatpush3.bf16.msra.mxu1 %v3400_v32 }
 0xea8   :  { %v1692_v26 = vpop.f32.mrb[20].mxu1 }
 0xea9   :  { %v1693_v27 = vadd.f32 %v3467_v18, %v1692_v26  ;;  %v2642_v28 = vpop.f32.mrb[21].mxu1 }
 0xeaa   :  { %v1695_v0 = vpop.f32.mrb[22].mxu1 }
 0xeab   :  { %1706 = vrot.lane.b32.xlu1 %v1693_v27, %s2860_s2  ;;  %v2643_v3 = vpop.f32.mrb[23].mxu1  ;;  %v1698_v19 = vadd.f32 %v1693_v27, %v1291_v31 }
 0xead   :  { %v2198_v33 = vmul.f32 -1.442695, %v1698_v19 }
 0xeaf   :  { %2831 = vpow2.f32 %v2198_v33 }
 0xeb9   :  { %v2832_v34 = vpop.eup %2831 }
 0xeba   :  { %v1702_v35 = vadd.f32 1.0, %v2832_v34 }
 0xebc   :  { %2833 = vrcp.f32 %v1702_v35 }
 0xec6   :  { %v2834_v21 = vpop.eup %2833 }
 0xec7   :  { %v1716_v44 = vsub.f32 1.0, %v2834_v21  ;;  %v1722_v2 = vmul.f32 %v2834_v21, %v3548_v22 }
 0xf1d   :  { %v1707_v37 = vpop.permute.xlu1 %1706 }
 0xf1e   :  { %v1709_v38 = vmul.f32 %v2834_v21, %v1707_v37 }
 0xf20   :  { %1711 = vrot.lane.b32.xlu0 %v1709_v38, %s2860_s2 }
 0xf92   :  { %v1712_v25 = vpop.permute.xlu0 %1711 }
 0xf93   :  { %v1714_v40 = vadd.f32 %v1712_v25, %v1291_v31 }
 0xf95   :  { %2835 = vtanh.f32 %v1714_v40 }
 0xf9f   :  { %v2836_v29 = vpop.eup %2835 }
 0xfa0   :  { %1718 = vrot.lane.b32.xlu1 %v2836_v29, %s2861_s24 }
0x1012   :  { %v1719_v45 = vpop.permute.xlu1 %1718 }
0x1013   :  { %v1721_v47 = vmul.f32 %v1719_v45, %v1716_v44  ;;  %v1304_v45 = vadd.f32 %v3458_v11, %v3486_v41 }
0x1015   :  { %v3566_v48 = vadd.f32 %v1722_v2, %v1721_v47 }
0x1017   :  { %v1730_v36 = vpack.c.bf16 %v3566_v48, %v3566_v48 }
0x1019   :  { %1732 = vrot.lane.b32.xlu0 %v1730_v36, %s2861_s24 }
0x108b   :  { %v1733_v49 = vpop.permute.xlu0 %1732 }
0x108c   :  { %2649 = vmatmul.mubr.msk.bf16.vlgmr.msra.gmra.mrb[80].mxu0 %vm1338_vm14, %v1733_v49 }
0x108d   :  { %2661 = vmatpush3.bf16.msra.mxu0 %v3394_v42  ;;  %2664 = vmatprep.mubr.msk.bf16.mxu0 %vm2856_vm1, %v2857_v10 }
0x108e   :  { %2662 = vmatprep.subr.bf16.mxu0 %v2857_v10 }
0x1091   :  { %2663 = vmatpush3.bf16.msra.mxu0 %v3400_v32 }
0x115f   :  { %v1771_v43 = vpop.f32.mrb[80].mxu0 }
0x1160   :  { %v1772_v8 = vadd.f32 %v3467_v18, %v1771_v43  ;;  %v2650_v50 = vpop.f32.mrb[81].mxu0 }
0x1161   :  { %v1774_v53 = vpop.f32.mrb[82].mxu0 }
0x1162   :  { %1785 = vrot.lane.b32.xlu1 %v1772_v8, %s2860_s2  ;;  %v2651_v51 = vpop.f32.mrb[83].mxu0  ;;  %v1777_v54 = vadd.f32 %v1772_v8, %v1296_v39 }
0x1164   :  { %v2200_v42 = vmul.f32 -1.442695, %v1777_v54 }
0x1166   :  { %2837 = vpow2.f32 %v2200_v42 }
0x1170   :  { %v2838_v55 = vpop.eup %2837 }
0x1171   :  { %v1781_v56 = vadd.f32 1.0, %v2838_v55 }
0x1173   :  { %2839 = vrcp.f32 %v1781_v56 }
0x117d   :  { %v2840_v10 = vpop.eup %2839 }
0x117e   :  { %v1795_v63 = vsub.f32 1.0, %v2840_v10  ;;  %v1801_v12 = vmul.f32 %v2840_v10, %v3566_v48 }
0x11d4   :  { %v1786_v57 = vpop.permute.xlu1 %1785 }
0x11d5   :  { %v1788_v32 = vmul.f32 %v2840_v10, %v1786_v57 }
0x11d7   :  { %1790 = vrot.lane.b32.xlu0 %v1788_v32, %s2860_s2 }
0x1249   :  { %v1791_v58 = vpop.permute.xlu0 %1790 }
0x124a   :  { %v1793_v59 = vadd.f32 %v1791_v58, %v1296_v39 }
0x124c   :  { %2841 = vtanh.f32 %v1793_v59 }
0x1256   :  { %v2842_v61 = vpop.eup %2841 }
0x1257   :  { %1797 = vrot.lane.b32.xlu1 %v2842_v61, %s2861_s24 }
0x12c9   :  { %v1798_v1 = vpop.permute.xlu1 %1797 }
0x12ca   :  { %v1800_v4 = vmul.f32 %v1798_v1, %v1795_v63 }
0x12cc   :  { %v3584_v5 = vadd.f32 %v1801_v12, %v1800_v4 }
0x12ce   :  { %v1809_v60 = vpack.c.bf16 %v3584_v5, %v3584_v5 }
0x12d0   :  { %1811 = vrot.lane.b32.xlu0 %v1809_v60, %s2861_s24 }
0x1342   :  { %v1812_v7 = vpop.permute.xlu0 %1811 }
0x1343   :  { %2657 = vmatmul.mubr.msk.bf16.vlgmr.msra.gmra.mrb[24].mxu1 %vm1338_vm14, %v1812_v7 }
0x1416   :  { %v1850_v9 = vpop.f32.mrb[24].mxu1 }
0x1417   :  { %v1851_v13 = vadd.f32 %v3467_v18, %v1850_v9  ;;  %v2658_v14 = vpop.f32.mrb[25].mxu1 }
0x1418   :  { %v1853_v16 = vpop.f32.mrb[26].mxu1  ;;  %v2205_v14 = vld [vmem:[%s3664_s3 + $0xd8] ss:$0 sm:$0xff] }
0x1419   :  { %1864 = vrot.lane.b32.xlu1 %v1851_v13, %s2860_s2  ;;  %v2659_v17 = vpop.f32.mrb[27].mxu1  ;;  %v1856_v62 = vadd.f32 %v1851_v13, %v1299_v20 }
0x141b   :  { %v2202_v6 = vmul.f32 -1.442695, %v1856_v62 }
0x141d   :  { %2843 = vpow2.f32 %v2202_v6 }
0x1427   :  { %v2844_v23 = vpop.eup %2843 }
0x1428   :  { %v1860_v24 = vadd.f32 1.0, %v2844_v23 }
0x142a   :  { %2845 = vrcp.f32 %v1860_v24 }
0x1434   :  { %v2846_v26 = vpop.eup %2845 }
0x1435   :  { %v1874_v19 = vsub.f32 1.0, %v2846_v26  ;;  %v1880_v15 = vmul.f32 %v2846_v26, %v3584_v5 }
0x148b   :  { %v1865_v27 = vpop.permute.xlu1 %1864 }
0x148c   :  { %v1867_v28 = vmul.f32 %v2846_v26, %v1865_v27 }
0x148e   :  { %1869 = vrot.lane.b32.xlu0 %v1867_v28, %s2860_s2 }
0x1500   :  { %v1870_v0 = vpop.permute.xlu0 %1869 }
0x1501   :  { %v1872_v3 = vadd.f32 %v1870_v0, %v1299_v20 }
0x1503   :  { %2847 = vtanh.f32 %v1872_v3 }
0x150d   :  { %v2848_v31 = vpop.eup %2847 }
0x150e   :  { %1876 = vrot.lane.b32.xlu1 %v2848_v31, %s2861_s24 }
0x1580   :  { %v1877_v33 = vpop.permute.xlu1 %1876 }
0x1581   :  { %v1879_v34 = vmul.f32 %v1877_v33, %v1874_v19 }
0x1583   :  { %v1881_v35 = vadd.f32 %v1880_v15, %v1879_v34 }
0x1585   :  { %v1888_v21 = vpack.c.bf16 %v1881_v35, %v1881_v35 }
0x1587   :  { %1890 = vrot.lane.b32.xlu0 %v1888_v21, %s2861_s24 }
0x15f9   :  { %v1891_v37 = vpop.permute.xlu0 %1890 }
0x15fa   :  { %2665 = vmatmul.mubr.msk.bf16.vlgmr.msra.gmra.mrb[84].mxu0 %vm1338_vm14, %v1891_v37 }
0x16cd   :  { %v1929_v38 = vpop.f32.mrb[84].mxu0 }
0x16ce   :  { %v1930_v25 = vadd.f32 %v3467_v18, %v1929_v38  ;;  %v2666_v40 = vpop.f32.mrb[85].mxu0 }
0x16cf   :  { %v1932_v29 = vpop.f32.mrb[86].mxu0 }
0x16d0   :  { %1943 = vrot.lane.b32.xlu1 %v1930_v25, %s2860_s2  ;;  %v2667_v44 = vpop.f32.mrb[87].mxu0  ;;  %v1935_v2 = vadd.f32 %v1930_v25, %v1304_v45 }
0x16d2   :  { %v2204_v47 = vmul.f32 -1.442695, %v1935_v2 }
0x16d4   :  { %2849 = vpow2.f32 %v2204_v47 }
0x16de   :  { %v2850_v36 = vpop.eup %2849 }
0x16df   :  { %v1939_v49 = vadd.f32 1.0, %v2850_v36 }
0x16e1   :  { %2851 = vrcp.f32 %v1939_v49 }
0x16eb   :  { %v2852_v43 = vpop.eup %2851 }
0x16ec   :  { %v1953_v54 = vsub.f32 1.0, %v2852_v43  ;;  %v1959_v55 = vmul.f32 %v2852_v43, %v1881_v35 }
0x1742   :  { %v1944_v8 = vpop.permute.xlu1 %1943 }
0x1743   :  { %v1946_v50 = vmul.f32 %v2852_v43, %v1944_v8 }
0x1745   :  { %1948 = vrot.lane.b32.xlu0 %v1946_v50, %s2860_s2 }
0x1749   :  { %1409 = vrot.lane.b32.xlu0 %v3491_v46, %s2861_s24  ;;  %v2803_v46 = vld [vmem:[%s3668_s4 + $0x90] sm:$0xff]  }
0x174a   :  { %2668 = vmatprep.subr.bf16.mxu1 %v2803_v46 }
0x174b   :  { %2669 = vmatpush3.bf16.msra.mxu1 %v2803_v46 }
0x174d   :  { %1567 = vrot.lane.b32.xlu0 %v3529_v52, %s2861_s24 }
0x1751   :  { %1725 = vrot.lane.b32.xlu0 %v3566_v48, %s2861_s24  ;;  %v2804_v48 = vld [vmem:[%s3668_s4 + $0x98] sm:$0xff]  }
0x1752   :  { %2670 = vmatprep.subr.bf16.mxu1 %v2804_v48 }
0x1753   :  { %2671 = vmatpush3.bf16.msra.mxu1 %v2804_v48 }
0x1755   :  { %1883 = vrot.lane.b32.xlu0 %v1881_v35, %s2861_s24 }
0x17b7   :  { %v1949_v11 = vpop.permute.xlu0 %1948 }
0x17b8   :  { %v1951_v18 = vadd.f32 %v1949_v11, %v1304_v45 }
0x17ba   :  { %2853 = vtanh.f32 %v1951_v18 }
0x17bb   :  { %v1410_v41 = vpop.permute.xlu0 %1409 }
0x17bc   :  { %1412 = vst.msk [vmem:[#allocation3] sm:$0xff] %vm1338_vm14, %v1410_v41 }
0x17bf   :  { %v1568_v53 = vpop.permute.xlu0 %1567 }
0x17c0   :  { %1570 = vst.msk [vmem:[#allocation3 + $0x10] sm:$0xff] %vm1338_vm14, %v1568_v53 }
0x17c3   :  { %v1726_v52 = vpop.permute.xlu0 %1725  ;;  %v1971_v58 = vld [vmem:[#allocation3] sm:$0xff] }
0x17c4   :  { %v2854_v51 = vpop.eup %2853  ;;  %1728 = vst.msk [vmem:[#allocation3 + $0x20] sm:$0xff] %vm1338_vm14, %v1726_v52 }
0x17c5   :  { %1955 = vrot.lane.b32.xlu1 %v2854_v51, %s2861_s24 }
0x17c7   :  { %v1884_v39 = vpop.permute.xlu0 %1883  ;;  %v1973_v61 = vld [vmem:[#allocation3 + $0x10] sm:$0xff] }
0x17c8   :  { %1886 = vst.msk [vmem:[#allocation3 + $0x30] sm:$0xff] %vm1338_vm14, %v1884_v39 }
0x17c9   :  { %1488 = vrot.lane.b32.xlu1 %v3510_v30, %s2861_s24 }
0x17cb   :  { %v1975_v12 = vld [vmem:[#allocation3 + $0x20] sm:$0xff] }
0x17cd   :  { %1646 = vrot.lane.b32.xlu1 %v3548_v22, %s2861_s24 }
0x17cf   :  { %v1977_v7 = vld [vmem:[#allocation3 + $0x30] sm:$0xff] }
0x17d1   :  { %1804 = vrot.lane.b32.xlu1 %v3584_v5, %s2861_s24 }
0x1837   :  { %v1956_v42 = vpop.permute.xlu1 %1955 }
0x1838   :  { %v1958_v56 = vmul.f32 %v1956_v42, %v1953_v54 }
0x183a   :  { %v1960_v10 = vadd.f32 %v1959_v55, %v1958_v56 }
0x183b   :  { %v1489_v57 = vpop.permute.xlu1 %1488 }
0x183c   :  { %1491 = vst.msk [vmem:[#allocation3 + $0x8] sm:$0xff] %vm1338_vm14, %v1489_v57  ;;  %1962 = vrot.lane.b32.xlu1 %v1960_v10, %s2861_s24 }
0x183f   :  { %v1647_v32 = vpop.permute.xlu1 %1646 }
0x1840   :  { %1649 = vst.msk [vmem:[#allocation3 + $0x18] sm:$0xff] %vm1338_vm14, %v1647_v32 }
0x1843   :  { %v1805_v30 = vpop.permute.xlu1 %1804  ;;  %v1972_v59 = vld [vmem:[#allocation3 + $0x8] sm:$0xff] }
0x1844   :  { %1807 = vst.msk [vmem:[#allocation3 + $0x28] sm:$0xff] %vm1338_vm14, %v1805_v30  ;;  %v1979_v22 = vpack.c.bf16 %v1972_v59, %v1971_v58 }
0x1846   :  { %2672 = vmatprep.mubr.msk.bf16.mxu1 %vm1338_vm14, %v1979_v22 }
0x1847   :  { %v1974_v63 = vld [vmem:[#allocation3 + $0x18] sm:$0xff] }
0x1848   :  { %v1980_v1 = vpack.c.bf16 %v1974_v63, %v1973_v61 }
0x184a   :  { %2673 = vmatmul.mubr.msk.bf16.vlgmr.msra.gmra.mrb[28].mxu1 %vm1338_vm14, %v1980_v1 }
0x184b   :  { %v1976_v4 = vld [vmem:[#allocation3 + $0x28] sm:$0xff] }
0x184c   :  { %v1981_v5 = vpack.c.bf16 %v1976_v4, %v1975_v12 }
0x184e   :  { %2676 = vmatprep.mubr.msk.bf16.mxu1 %vm1338_vm14, %v1981_v5 }
0x18ae   :  { %v1963_v60 = vpop.permute.xlu1 %1962 }
0x18af   :  { %1965 = vst.msk [vmem:[#allocation3 + $0x38] sm:$0xff] %vm1338_vm14, %v1963_v60 }
0x18b6   :  { %v1978_v9 = vld [vmem:[#allocation3 + $0x38] sm:$0xff] }
0x18b7   :  { %v1982_v13 = vpack.c.bf16 %v1978_v9, %v1977_v7 }
0x18b9   :  { %2677 = vmatmul.mubr.msk.bf16.gmra.mrb[32].mxu1 %vm1338_vm14, %v1982_v13 }
0x191d   :  { %v2674_v16 = vpop.f32.mrb[28].mxu1 }
0x191e   :  { %v2054_v17 = vadd.f32 %v2674_v16, %v2205_v14  ;;  %v2045_v20 = vpop.f32.mrb[29].mxu1 }
0x191f   :  { %v2046_v62 = vadd.f32 %v2205_v14, %v2045_v20  ;;  %v2675_v6 = vpop.f32.mrb[30].mxu1 }
0x1920   :  { %2078 = vst [vmem:[%s3669_s5 + $0x10] sm:$0xff] %v2054_v17  ;;  %v2057_v23 = vadd.f32 %v2675_v6, %v2205_v14  ;;  %v2048_v24 = vpop.f32.mrb[31].mxu1 }
0x1921   :  { %2076 = vst [vmem:[%s3669_s5] sm:$0xff] %v2046_v62  ;;  %v2049_v26 = vadd.f32 %v2205_v14, %v2048_v24 }
0x1922   :  { %2079 = vst [vmem:[%s3669_s5 + $0x18] sm:$0xff] %v2057_v23 }
0x1923   :  { %2077 = vst [vmem:[%s3669_s5 + $0x8] sm:$0xff] %v2049_v26 }
0x198c   :  { %v2678_v27 = vpop.f32.mrb[32].mxu1 }
0x198d   :  { %v2070_v28 = vadd.f32 %v2678_v27, %v2205_v14  ;;  %v2061_v0 = vpop.f32.mrb[33].mxu1 }
0x198e   :  { %v2062_v3 = vadd.f32 %v2205_v14, %v2061_v0  ;;  %v2679_v31 = vpop.f32.mrb[34].mxu1 }
0x198f   :  { %2082 = vst [vmem:[%s3669_s5 + $0x30] sm:$0xff] %v2070_v28  ;;  %v2073_v19 = vadd.f32 %v2679_v31, %v2205_v14  ;;  %v2064_v33 = vpop.f32.mrb[35].mxu1 }
0x1990   :  { %2080 = vst [vmem:[%s3669_s5 + $0x20] sm:$0xff] %v2062_v3  ;;  %v2065_v15 = vadd.f32 %v2205_v14, %v2064_v33 }
0x1991   :  { %2083 = vst [vmem:[%s3669_s5 + $0x38] sm:$0xff] %v2073_v19 }
0x1992   :  { %2081 = vst [vmem:[%s3669_s5 + $0x28] sm:$0xff] %v2065_v15 }

</bundles_post_ra>
